<compile_context>
chip_gen: v5e
topology: v5e:2x2
jax: 0.10.0
libtpu: 0.0.40
codegen_flags: <defaults>
</compile_context>

<pallas_src>
import functools

import jax
import jax.numpy as jnp
from jax.experimental import pallas as pl
from jax.experimental.pallas import tpu as pltpu

HIDDEN = 768
FC1_OUT = 512
NUM_CLASSES = 5
N_PAD = 128          # lane-dense padded output width (multiple of 128)


def _round_up(x, m):
    return ((x + m - 1) // m) * m


def _pick_tb(B):
    """Batch tile: bf16-native (multiple of 16), large enough to amortize
    per-step overhead, small enough to give >= 2 grid steps when B >= 32
    (so v7x can shard the parallel axis across both TensorCores)."""
    if B <= 16:
        return 16
    if B < 128:
        desired = _round_up(B, 16)
    elif B < 256:
        desired = 128
    else:
        desired = 256
    if B >= 32:
        half = _round_up(-(-B // 2), 16)   # ceil(B/2) rounded up to 16
        desired = min(desired, half)
    return desired


def head_kernel(cls_ref, w1_ref, b1_ref, w2_ref, b2_ref, out_ref):
    # cls_ref: [TB, 768] bf16, w1_ref: [768, 512] bf16, b1_ref: [1, 512] f32
    # w2_ref: [512, 128] bf16 (zero-padded cols 5..127), b2_ref: [1, 128] f32
    # fc1 + bias + ReLU (bf16 inputs, f32 accumulation on the MXU)
    h = jnp.dot(cls_ref[...], w1_ref[...],
                preferred_element_type=jnp.float32)
    h = jnp.maximum(h + b1_ref[...], 0.0)
    # Dropout(0.1) -> identity at inference time.
    # fc2 + bias: bf16 matmul with f32 accumulation, lane-dense 128-wide output.
    out = jnp.dot(h.astype(jnp.bfloat16), w2_ref[...],
                  preferred_element_type=jnp.float32) + b2_ref[...]
    out_ref[...] = out.astype(out_ref.dtype)


def prepare_head_params(w1, b1, w2, b2):
    """One-time (init-time) weight prep: bf16 casts + fc2 lane padding.

    Keeping this out of the per-call path removes ~2.5 MiB of HBM traffic
    and several XLA launches per forward.
    """
    return {
        "w1": w1.astype(jnp.bfloat16),                              # [768, 512]
        "b1": b1.astype(jnp.float32).reshape(1, FC1_OUT),           # [1, 512]
        "w2": jnp.pad(w2.astype(jnp.bfloat16),
                      ((0, 0), (0, N_PAD - NUM_CLASSES))),          # [512, 128]
        "b2": jnp.pad(b2.astype(jnp.float32).reshape(1, NUM_CLASSES),
                      ((0, 0), (0, N_PAD - NUM_CLASSES))),          # [1, 128]
    }


def tabu_head(cls_bf16, head_params):
    """cls_bf16: [B, 768] bf16 -> logits [B, NUM_CLASSES] f32."""
    B = cls_bf16.shape[0]
    TB = _pick_tb(B)
    B_pad = _round_up(B, TB)
    if B_pad != B:
        cls_bf16 = jnp.pad(cls_bf16, ((0, B_pad - B), (0, 0)))

    grid = (B_pad // TB,)

    out = pl.pallas_call(
        head_kernel,
        out_shape=jax.ShapeDtypeStruct((B_pad, N_PAD), jnp.bfloat16),
        grid_spec=pltpu.PrefetchScalarGridSpec(
            num_scalar_prefetch=0,
            grid=grid,
            in_specs=[
                # CLS tile: new batch block each step (double-buffered DMA).
                pl.BlockSpec((TB, HIDDEN), lambda i: (i, 0)),
                # Weights / biases: resident across all grid steps.
                pl.BlockSpec((HIDDEN, FC1_OUT), lambda i: (0, 0)),
                pl.BlockSpec((1, FC1_OUT), lambda i: (0, 0)),
                pl.BlockSpec((FC1_OUT, N_PAD), lambda i: (0, 0)),
                pl.BlockSpec((1, N_PAD), lambda i: (0, 0)),
            ],
            out_specs=pl.BlockSpec((TB, N_PAD), lambda i: (i, 0)),
        ),
        compiler_params=pltpu.CompilerParams(
            dimension_semantics=("parallel",),
            vmem_limit_bytes=32 * 1024 * 1024,
        ),
    )(cls_bf16, head_params["w1"], head_params["b1"],
      head_params["w2"], head_params["b2"])

    # Padded logit columns 5..127 are exactly zero; the slice MUST stay.
    return out[:B, :NUM_CLASSES].astype(jnp.float32)


def synthetic_tabu_cls(sent_id, mask, embedding_table):
    """CLS row of the deterministic stand-in for the external `tabu` encoder.

    Equivalent to (emb[sent_id] * mask[..., None])[:, 0, :] without ever
    materializing the [B, S, HIDDEN] hidden-state tensor.  Returns bf16
    directly so the cast fuses with the gather under jit.
    """
    cls = embedding_table[sent_id[:, 0]]                       # [B, H] f32
    cls = cls * mask[:, 0:1].astype(cls.dtype)
    return cls.astype(jnp.bfloat16)


@functools.partial(jax.jit, static_argnames=())
def tabu_architecture_forward(sent_id, mask, emb, head_params):
    cls_bf16 = synthetic_tabu_cls(sent_id, mask, emb)          # [B, 768] bf16
    return tabu_head(cls_bf16, head_params)                    # [B, 5] f32


if __name__ == "__main__":
    key = jax.random.PRNGKey(0)
    k_emb, k_w1, k_b1, k_w2, k_b2, k_tok = jax.random.split(key, 6)

    B, S, VOCAB = 2, 8, 32

    # synthetic backbone embedding table
    emb = jax.random.normal(k_emb, (VOCAB, HIDDEN), jnp.float32) * 0.02
    # fc1: nn.Linear(768, 512)  (stored as [in, out])
    w1 = jax.random.normal(k_w1, (HIDDEN, FC1_OUT), jnp.float32) \
        * (1.0 / jnp.sqrt(HIDDEN))
    b1 = jax.random.normal(k_b1, (1, FC1_OUT), jnp.float32) * 0.01
    # fc2: nn.Linear(512, 5)
    w2 = jax.random.normal(k_w2, (FC1_OUT, NUM_CLASSES), jnp.float32) \
        * (1.0 / jnp.sqrt(FC1_OUT))
    b2 = jax.random.normal(k_b2, (1, NUM_CLASSES), jnp.float32) * 0.01

    # One-time weight prep (hoisted out of the hot path).
    head_params = prepare_head_params(w1, b1, w2, b2)

    sent_id = jax.random.randint(k_tok, (B, S), 0, VOCAB, dtype=jnp.int32)
    mask = jnp.ones((B, S), dtype=jnp.int32).at[:, S - 2:].set(0)  # pad tail

    logits = tabu_architecture_forward(sent_id, mask, emb, head_params)
    jax.block_until_ready(logits)

    # reference check in plain JAX (f32; kernel uses bf16 fc1/fc2 inputs and a
    # bf16 output with f32 accumulation, hence the relaxed tolerance)
    cls_ref = (emb[sent_id[:, 0]] * mask[:, 0:1].astype(jnp.float32))
    ref = jnp.maximum(cls_ref @ w1 + b1, 0.0)
    ref = ref @ w2 + b2
    assert logits.shape == (B, NUM_CLASSES)
    assert jnp.allclose(logits, ref, atol=2e-2, rtol=2e-2)

    print("KERNEL_OK")
</pallas_src>

<mosaic_0001>
module attributes {stable_mosaic.version = 11 : i64} {
  func.func @head_kernel(%arg0: i32, %arg1: memref<16x768xbf16, #tpu.memory_space<vmem>>, %arg2: memref<768x512xbf16, #tpu.memory_space<vmem>>, %arg3: memref<1x512xf32, #tpu.memory_space<vmem>>, %arg4: memref<512x128xbf16, #tpu.memory_space<vmem>>, %arg5: memref<1x128xf32, #tpu.memory_space<vmem>>, %arg6: memref<16x128xbf16, #tpu.memory_space<vmem>>) attributes {dimension_semantics = [#tpu.dimension_semantics<parallel>], iteration_bounds = array<i64: 1>, scalar_prefetch = 0 : i64, scratch_operands = 0 : i64, tpu.core_type = #tpu.core_type<tc>, window_params = [{transform_indices = @transform_0, window_bounds = array<i64: 16, 768>}, {pipeline_mode = #tpu.pipeline_mode<synchronous>, transform_indices = @transform_1, window_bounds = array<i64: 768, 512>}, {pipeline_mode = #tpu.pipeline_mode<synchronous>, transform_indices = @transform_2, window_bounds = array<i64: 1, 512>}, {pipeline_mode = #tpu.pipeline_mode<synchronous>, transform_indices = @transform_3, window_bounds = array<i64: 512, 128>}, {pipeline_mode = #tpu.pipeline_mode<synchronous>, transform_indices = @transform_4, window_bounds = array<i64: 1, 128>}, {transform_indices = @transform_5, window_bounds = array<i64: 16, 128>}]} {
    %c0 = arith.constant 0 : index
    %c0_0 = arith.constant 0 : index
    %0 = vector.load %arg1[%c0, %c0_0] : memref<16x768xbf16, #tpu.memory_space<vmem>>, vector<16x768xbf16>
    %c0_1 = arith.constant 0 : index
    %c0_2 = arith.constant 0 : index
    %1 = vector.load %arg2[%c0_1, %c0_2] : memref<768x512xbf16, #tpu.memory_space<vmem>>, vector<768x512xbf16>
    %cst = arith.constant dense<0.000000e+00> : vector<16x512xf32>
    %2 = tpu.matmul %0, %1, %cst {dimension_numbers = #tpu.dot_dimension_numbers<[1], [0], [0], [1], [0, 0, 1, 1], [], []>} : vector<16x768xbf16>, vector<768x512xbf16>, vector<16x512xf32> -> vector<16x512xf32>
    %c0_3 = arith.constant 0 : index
    %c0_4 = arith.constant 0 : index
    %3 = vector.load %arg3[%c0_3, %c0_4] : memref<1x512xf32, #tpu.memory_space<vmem>>, vector<1x512xf32>
    %4 = vector.broadcast %3 : vector<1x512xf32> to vector<16x512xf32>
    %5 = arith.addf %2, %4 : vector<16x512xf32>
    %cst_5 = arith.constant 0.000000e+00 : f32
    %6 = vector.broadcast %cst_5 : f32 to vector<16x512xf32>
    %7 = arith.maximumf %5, %6 : vector<16x512xf32>
    %8 = arith.truncf %7 : vector<16x512xf32> to vector<16x512xbf16>
    %c0_6 = arith.constant 0 : index
    %c0_7 = arith.constant 0 : index
    %9 = vector.load %arg4[%c0_6, %c0_7] : memref<512x128xbf16, #tpu.memory_space<vmem>>, vector<512x128xbf16>
    %cst_8 = arith.constant dense<0.000000e+00> : vector<16x128xf32>
    %10 = tpu.matmul %8, %9, %cst_8 {dimension_numbers = #tpu.dot_dimension_numbers<[1], [0], [0], [1], [0, 0, 1, 1], [], []>} : vector<16x512xbf16>, vector<512x128xbf16>, vector<16x128xf32> -> vector<16x128xf32>
    %c0_9 = arith.constant 0 : index
    %c0_10 = arith.constant 0 : index
    %11 = vector.load %arg5[%c0_9, %c0_10] : memref<1x128xf32, #tpu.memory_space<vmem>>, vector<1x128xf32>
    %12 = vector.broadcast %11 : vector<1x128xf32> to vector<16x128xf32>
    %13 = arith.addf %10, %12 : vector<16x128xf32>
    %14 = arith.truncf %13 : vector<16x128xf32> to vector<16x128xbf16>
    %c0_11 = arith.constant 0 : index
    %c0_12 = arith.constant 0 : index
    %15 = vector.load %arg6[%c0_11, %c0_12] : memref<16x128xbf16, #tpu.memory_space<vmem>>, vector<16x128xbf16>
    tpu.vector_store %arg6[%c0_11, %c0_12], %14 {strides = array<i32>} : memref<16x128xbf16, #tpu.memory_space<vmem>>, vector<16x128xbf16>,
    return
  }
  func.func @transform_0(%arg0: i32) -> (i32, i32) {
    %c0_i32 = arith.constant 0 : i32
    %c0_i32_0 = arith.constant 0 : i32
    return %arg0, %c0_i32 : i32, i32
  }
  func.func @transform_1(%arg0: i32) -> (i32, i32) {
    %c0_i32 = arith.constant 0 : i32
    %c0_i32_0 = arith.constant 0 : i32
    %c0_i32_1 = arith.constant 0 : i32
    return %c0_i32, %c0_i32_0 : i32, i32
  }
  func.func @transform_2(%arg0: i32) -> (i32, i32) {
    %c0_i32 = arith.constant 0 : i32
    %c0_i32_0 = arith.constant 0 : i32
    %c0_i32_1 = arith.constant 0 : i32
    return %c0_i32, %c0_i32_0 : i32, i32
  }
  func.func @transform_3(%arg0: i32) -> (i32, i32) {
    %c0_i32 = arith.constant 0 : i32
    %c0_i32_0 = arith.constant 0 : i32
    %c0_i32_1 = arith.constant 0 : i32
    return %c0_i32, %c0_i32_0 : i32, i32
  }
  func.func @transform_4(%arg0: i32) -> (i32, i32) {
    %c0_i32 = arith.constant 0 : i32
    %c0_i32_0 = arith.constant 0 : i32
    %c0_i32_1 = arith.constant 0 : i32
    return %c0_i32, %c0_i32_0 : i32, i32
  }
  func.func @transform_5(%arg0: i32) -> (i32, i32) {
    %c0_i32 = arith.constant 0 : i32
    %c0_i32_0 = arith.constant 0 : i32
    return %arg0, %c0_i32 : i32, i32
  }
}

</mosaic_0001>

<bundles_post_ra>
// kernel: tabu_architecture_forward.1
= control target key start
LH: loop header
LB: loop body
LE: loop exit
PB: predicated region body
PF: predicated region fallthrough
CT: control target
= control target key end

     0   :  { %10 = vsyncpa [#allocation3], 0  ;;  %s3267_s0 = inlined_call_operand.vmem [shape: bf16[16,768], index: 0, kind: input, shape index: {}]   ;;  %s3268_s1 = inlined_call_operand.hbm [shape: bf16[768,512], index: 1, kind: input, shape index: {}]   ;;  %s3269_s2 = inlined_call_operand.vmem [shape: f32[1,512], index: 2, kind: input, shape index: {}]   ;;  %s3270_s3 = inlined_call_operand.hbm [shape: bf16[512,128], index: 3, kind: input, shape index: {}]   ;;  %s3271_s4 = inlined_call_operand.vmem [shape: f32[1,128], index: 4, kind: input, shape index: {}]   ;;  %s3272_s5 = inlined_call_operand.vmem [shape: bf16[16,128], index: 5, kind: output, shape index: {}]  }
   0x1   :  { %s18_s20 = sshll.u32 %s3268_s1, 4  ;;  %s19_s20 = int_to_ptr.hbm [resolvable:$true] %s18_s20 }
   0x2   :  { %11 = vsyncpa [#allocation5], 0  ;;  %s3138_s21 = smov [#allocation2]   ;;  %s33_s25 = sshll.u32 %s3270_s3, 4  ;;  %s34_s25 = int_to_ptr.hbm [resolvable:$true] %s33_s25 }
   0x3   :  { %s20_s22 = sshll.u32 %s3138_s21, 4  ;;  %s3139_s26 = smov 256   ;;  %s21_s22 = int_to_ptr.vmem [resolvable:$true] %s20_s22 }
   0x4   :  { %s3140_s27 = smov 16   ;;  %s3141_s28 = smov [#allocation4]  }
   0x5   :  { %26 = dma.hbm_to_vmem [thread:$0]  %s19_s20, 24576, %s21_s22, [#allocation3], %s3139_s26, %s3139_s26, %s3140_s27  }
   0x6   :  { %s35_s29 = sshll.u32 %s3141_s28, 4  ;;  %s3142_s30 = smov 64   ;;  %s36_s29 = int_to_ptr.vmem [resolvable:$true] %s35_s29 }
   0x7   :  { %s3143_s6 = smov 4  }
   0x8   :  { %41 = dma.hbm_to_vmem [thread:$0]  %s34_s25, 4096, %s36_s29, [#allocation5], %s3142_s30, %s3142_s30, %s3143_s6  }
   0x9   :  { %3134 = dma.done.wait [#allocation3], 24576  }
   0xa   :  { %3135 = vsyncadd [#allocation3], 4294942720 }
   0xb   :  { %3136 = dma.done.wait [#allocation5], 4096  }
   0xc   :  { %3137 = vsyncadd [#allocation5], 4294963200  ;;  %v2062_v0 = vld [vmem:[#allocation2 + $0xe0] sm:$0xf]  ;;  %v2880_v1 = vld [vmem:[#allocation2 + $0xec] sm:$0xf0] }
   0xd   :  { %v2190_v2 = vld [vmem:[#allocation2 + $0x1e0] sm:$0xf]  ;;  %v2063_v3 = vor.u32 %v2880_v1, %v2062_v0  ;;  %v2912_v4 = vld [vmem:[#allocation2 + $0x1ec] sm:$0xf0] }
   0xe   :  { %v2318_v5 = vld [vmem:[#allocation2 + $0x2e0] sm:$0xf]  ;;  %v2944_v6 = vld [vmem:[#allocation2 + $0x2ec] sm:$0xf0]  ;;  %v2191_v7 = vor.u32 %v2912_v4, %v2190_v2 }
   0xf   :  { %v2319_v8 = vor.u32 %v2944_v6, %v2318_v5  ;;  %v2446_v9 = vld [vmem:[#allocation2 + $0x3e0] sm:$0xf]  ;;  %v2976_v10 = vld [vmem:[#allocation2 + $0x3ec] sm:$0xf0]  ;;  %1250 = vmatpush.bf16.msra.mxu0 %v2063_v3 }
  0x10   :  { %v2046_v11 = vld [vmem:[#allocation2 + $0xc0] sm:$0xf]  ;;  %v2447_v12 = vor.u32 %v2976_v10, %v2446_v9  ;;  %v2876_v13 = vld [vmem:[#allocation2 + $0xcc] sm:$0xf0]  ;;  %1264 = vmatpush.bf16.msra.mxu1 %v2191_v7 }
  0x11   :  { %v2174_v14 = vld [vmem:[#allocation2 + $0x1c0] sm:$0xf]  ;;  %v2908_v15 = vld [vmem:[#allocation2 + $0x1cc] sm:$0xf0]  ;;  %1278 = vmatpush.bf16.msra.mxu2 %v2319_v8  ;;  %v2047_v16 = vor.u32 %v2876_v13, %v2046_v11 }
  0x12   :  { %v2175_v17 = vor.u32 %v2908_v15, %v2174_v14  ;;  %v2302_v18 = vld [vmem:[#allocation2 + $0x2c0] sm:$0xf]  ;;  %v2940_v19 = vld [vmem:[#allocation2 + $0x2cc] sm:$0xf0]  ;;  %1292 = vmatpush.bf16.msra.mxu3 %v2447_v12 }
  0x13   :  { %v2430_v20 = vld [vmem:[#allocation2 + $0x3c0] sm:$0xf]  ;;  %v2303_v21 = vor.u32 %v2940_v19, %v2302_v18  ;;  %v2972_v22 = vld [vmem:[#allocation2 + $0x3cc] sm:$0xf0]  ;;  %1251 = vmatpush.bf16.msra.mxu0 %v2047_v16 }
  0x14   :  { %v2030_v23 = vld [vmem:[#allocation2 + $0xa0] sm:$0xf]  ;;  %v2872_v24 = vld [vmem:[#allocation2 + $0xac] sm:$0xf0]  ;;  %v2431_v25 = vor.u32 %v2972_v22, %v2430_v20  ;;  %1265 = vmatpush.bf16.msra.mxu1 %v2175_v17 }
  0x15   :  { %v2158_v26 = vld [vmem:[#allocation2 + $0x1a0] sm:$0xf]  ;;  %v2904_v27 = vld [vmem:[#allocation2 + $0x1ac] sm:$0xf0]  ;;  %v2031_v29 = vor.u32 %v2872_v24, %v2030_v23  ;;  %1279 = vmatpush.bf16.msra.mxu2 %v2303_v21 }
  0x16   :  { %v2286_v28 = vld [vmem:[#allocation2 + $0x2a0] sm:$0xf]  ;;  %v2936_v30 = vld [vmem:[#allocation2 + $0x2ac] sm:$0xf0]  ;;  %v2159_v33 = vor.u32 %v2904_v27, %v2158_v26  ;;  %1293 = vmatpush.bf16.msra.mxu3 %v2431_v25 }
  0x17   :  { %v2414_v31 = vld [vmem:[#allocation2 + $0x3a0] sm:$0xf]  ;;  %v2968_v32 = vld [vmem:[#allocation2 + $0x3ac] sm:$0xf0]  ;;  %v2287_v34 = vor.u32 %v2936_v30, %v2286_v28  ;;  %1252 = vmatpush.bf16.msra.mxu0 %v2031_v29 }
  0x18   :  { %v2014_v35 = vld [vmem:[#allocation2 + $0x80] sm:$0xf]  ;;  %v2868_v36 = vld [vmem:[#allocation2 + $0x8c] sm:$0xf0]  ;;  %v2415_v38 = vor.u32 %v2968_v32, %v2414_v31  ;;  %1266 = vmatpush.bf16.msra.mxu1 %v2159_v33  ;;  %v2878_v33 = vld [vmem:[#allocation2 + $0xe4] sm:$0xf] }
  0x19   :  { %v2142_v37 = vld [vmem:[#allocation2 + $0x180] sm:$0xf]  ;;  %v2900_v39 = vld [vmem:[#allocation2 + $0x18c] sm:$0xf0]  ;;  %v2015_v44 = vor.u32 %v2868_v36, %v2014_v35  ;;  %1280 = vmatpush.bf16.msra.mxu2 %v2287_v34  ;;  %v2064_v34 = vld [vmem:[#allocation2 + $0xf0] sm:$0xf0] }
  0x1a   :  { %v2270_v40 = vld [vmem:[#allocation2 + $0x280] sm:$0xf]  ;;  %v2932_v41 = vld [vmem:[#allocation2 + $0x28c] sm:$0xf0]  ;;  %v2143_v45 = vor.u32 %v2900_v39, %v2142_v37  ;;  %1294 = vmatpush.bf16.msra.mxu3 %v2415_v38  ;;  %v2910_v37 = vld [vmem:[#allocation2 + $0x1e4] sm:$0xf] }
  0x1b   :  { %v2398_v42 = vld [vmem:[#allocation2 + $0x380] sm:$0xf]  ;;  %v2964_v43 = vld [vmem:[#allocation2 + $0x38c] sm:$0xf0]  ;;  %v2271_v46 = vor.u32 %v2932_v41, %v2270_v40  ;;  %1253 = vmatpush.bf16.msra.mxu0 %v2015_v44  ;;  %v2192_v38 = vld [vmem:[#allocation2 + $0x1f0] sm:$0xf0] }
  0x1c   :  { %v1998_v47 = vld [vmem:[#allocation2 + $0x60] sm:$0xf]  ;;  %v2864_v48 = vld [vmem:[#allocation2 + $0x6c] sm:$0xf0]  ;;  %v2399_v50 = vor.u32 %v2964_v43, %v2398_v42  ;;  %1267 = vmatpush.bf16.msra.mxu1 %v2143_v45  ;;  %v2067_v43 = vor.u32 %v2878_v33, %v2064_v34  ;;  %v2000_v33 = vld [vmem:[#allocation2 + $0x70] sm:$0xf0] }
  0x1d   :  { %v2126_v49 = vld [vmem:[#allocation2 + $0x160] sm:$0xf]  ;;  %v2896_v51 = vld [vmem:[#allocation2 + $0x16c] sm:$0xf0]  ;;  %v1999_v56 = vor.u32 %v2864_v48, %v1998_v47  ;;  %1281 = vmatpush.bf16.msra.mxu2 %v2271_v46  ;;  %v2195_v47 = vor.u32 %v2910_v37, %v2192_v38  ;;  %v2874_v48 = vld [vmem:[#allocation2 + $0xc4] sm:$0xf] }
  0x1e   :  { %v2254_v52 = vld [vmem:[#allocation2 + $0x260] sm:$0xf]  ;;  %v2928_v53 = vld [vmem:[#allocation2 + $0x26c] sm:$0xf0]  ;;  %v2127_v57 = vor.u32 %v2896_v51, %v2126_v49  ;;  %1295 = vmatpush.bf16.msra.mxu3 %v2399_v50  ;;  %v2048_v49 = vld [vmem:[#allocation2 + $0xd0] sm:$0xf0] }
  0x1f   :  { %v2382_v54 = vld [vmem:[#allocation2 + $0x360] sm:$0xf]  ;;  %v2960_v55 = vld [vmem:[#allocation2 + $0x36c] sm:$0xf0]  ;;  %v2255_v58 = vor.u32 %v2928_v53, %v2254_v52  ;;  %1254 = vmatpush.bf16.msra.mxu0 %v1999_v56  ;;  %v2906_v50 = vld [vmem:[#allocation2 + $0x1c4] sm:$0xf] }
  0x20   :  { %v1982_v59 = vld [vmem:[#allocation2 + $0x40] sm:$0xf]  ;;  %v2860_v60 = vld [vmem:[#allocation2 + $0x4c] sm:$0xf0]  ;;  %v2383_v62 = vor.u32 %v2960_v55, %v2382_v54  ;;  %1268 = vmatpush.bf16.msra.mxu1 %v2127_v57  ;;  %v2176_v51 = vld [vmem:[#allocation2 + $0x1d0] sm:$0xf0] }
  0x21   :  { %v2110_v61 = vld [vmem:[#allocation2 + $0x140] sm:$0xf]  ;;  %v2892_v63 = vld [vmem:[#allocation2 + $0x14c] sm:$0xf0]  ;;  %v1983_v4 = vor.u32 %v2860_v60, %v1982_v59  ;;  %1282 = vmatpush.bf16.msra.mxu2 %v2255_v58  ;;  %v2847_v53 = vld [vmem:[%s3267_s0 + $0x14] sm:$0xf0]  ;;  %v2051_v59 = vor.u32 %v2874_v48, %v2048_v49 }
  0x22   :  { %v2238_v0 = vld [vmem:[#allocation2 + $0x240] sm:$0xf]  ;;  %v2924_v1 = vld [vmem:[#allocation2 + $0x24c] sm:$0xf0]  ;;  %v2111_v5 = vor.u32 %v2892_v63, %v2110_v61  ;;  %1296 = vmatpush.bf16.msra.mxu3 %v2383_v62  ;;  %v2870_v62 = vld [vmem:[#allocation2 + $0xa4] sm:$0xf]  ;;  %v2179_v63 = vor.u32 %v2906_v50, %v2176_v51 }
  0x23   :  { %v2366_v2 = vld [vmem:[#allocation2 + $0x340] sm:$0xf]  ;;  %v2956_v3 = vld [vmem:[#allocation2 + $0x34c] sm:$0xf0]  ;;  %v2239_v6 = vor.u32 %v2924_v1, %v2238_v0  ;;  %1255 = vmatpush.bf16.msra.mxu0 %v1983_v4  ;;  %v2032_v0 = vld [vmem:[#allocation2 + $0xb0] sm:$0xf0] }
  0x24   :  { %v1966_v7 = vld [vmem:[#allocation2 + $0x20] sm:$0xf]  ;;  %v2856_v8 = vld [vmem:[#allocation2 + $0x2c] sm:$0xf0]  ;;  %v2367_v10 = vor.u32 %v2956_v3, %v2366_v2  ;;  %1269 = vmatpush.bf16.msra.mxu1 %v2111_v5  ;;  %v2844_v1 = vld [vmem:[%s3267_s0 + $0x4] sm:$0xf] }
  0x25   :  { %v2094_v9 = vld [vmem:[#allocation2 + $0x120] sm:$0xf]  ;;  %v2888_v11 = vld [vmem:[#allocation2 + $0x12c] sm:$0xf0]  ;;  %v1967_v16 = vor.u32 %v2856_v8, %v1966_v7  ;;  %1283 = vmatpush.bf16.msra.mxu2 %v2239_v6  ;;  %v1928_v2 = vld [vmem:[%s3267_s0 + $0x18] sm:$0xf0] }
  0x26   :  { %v2222_v12 = vld [vmem:[#allocation2 + $0x220] sm:$0xf]  ;;  %v2920_v13 = vld [vmem:[#allocation2 + $0x22c] sm:$0xf0]  ;;  %v2095_v19 = vor.u32 %v2888_v11, %v2094_v9  ;;  %1297 = vmatpush.bf16.msra.mxu3 %v2367_v10  ;;  %v2902_v3 = vld [vmem:[#allocation2 + $0x1a4] sm:$0xf]  ;;  %v3195_v6 = vor.u32 %v2844_v1, %v1928_v2 }
  0x27   :  { %v2350_v14 = vld [vmem:[#allocation2 + $0x320] sm:$0xf]  ;;  %v2952_v15 = vld [vmem:[#allocation2 + $0x32c] sm:$0xf0]  ;;  %v2223_v20 = vor.u32 %v2920_v13, %v2222_v12  ;;  %1256 = vmatpush.bf16.msra.mxu0 %v1967_v16  ;;  %v2160_v4 = vld [vmem:[#allocation2 + $0x1b0] sm:$0xf0]  ;;  %v2035_v12 = vor.u32 %v2870_v62, %v2032_v0 }
  0x28   :  { %v1950_v17 = vld [vmem:[#allocation2] sm:$0xf]  ;;  %v2852_v18 = vld [vmem:[#allocation2 + $0xc] sm:$0xf0]  ;;  %v2351_v24 = vor.u32 %v2952_v15, %v2350_v14  ;;  %1270 = vmatpush.bf16.msra.mxu1 %v2095_v19  ;;  %v2866_v13 = vld [vmem:[#allocation2 + $0x84] sm:$0xf]  ;;  %v2163_v16 = vor.u32 %v2902_v3, %v2160_v4 }
  0x29   :  { %v2078_v21 = vld [vmem:[#allocation2 + $0x100] sm:$0xf]  ;;  %v2884_v22 = vld [vmem:[#allocation2 + $0x10c] sm:$0xf0]  ;;  %v1951_v31 = vor.u32 %v2852_v18, %v1950_v17  ;;  %1284 = vmatpush.bf16.msra.mxu2 %v2223_v20  ;;  %v2016_v14 = vld [vmem:[#allocation2 + $0x90] sm:$0xf0] }
  0x2a   :  { %v2206_v23 = vld [vmem:[#allocation2 + $0x200] sm:$0xf]  ;;  %v2916_v25 = vld [vmem:[#allocation2 + $0x20c] sm:$0xf0]  ;;  %v2079_v35 = vor.u32 %v2884_v22, %v2078_v21  ;;  %1298 = vmatpush.bf16.msra.mxu3 %v2351_v24  ;;  %v1934_v15 = vld [vmem:[%s3267_s0 + $0x8] sm:$0xf] }
  0x2b   :  { %v2334_v26 = vld [vmem:[#allocation2 + $0x300] sm:$0xf]  ;;  %v2948_v27 = vld [vmem:[#allocation2 + $0x30c] sm:$0xf0]  ;;  %v2207_v36 = vor.u32 %v2916_v25, %v2206_v23  ;;  %1257 = vmatpush.bf16.msra.mxu0 %v1951_v31  ;;  %v2845_v18 = vld [vmem:[%s3267_s0 + $0xc] sm:$0xf] }
  0x2c   :  { %v2574_v28 = vld [vmem:[#allocation2 + $0x4e0] sm:$0xf]  ;;  %v3008_v29 = vld [vmem:[#allocation2 + $0x4ec] sm:$0xf0]  ;;  %v2335_v39 = vor.u32 %v2948_v27, %v2334_v26  ;;  %1271 = vmatpush.bf16.msra.mxu1 %v2079_v35  ;;  %v1936_v19 = vld [vmem:[%s3267_s0 + $0x20] sm:$0xf0]  ;;  %v2019_v26 = vor.u32 %v2866_v13, %v2016_v14 }
  0x2d   :  { %v2702_v30 = vld [vmem:[#allocation2 + $0x5e0] sm:$0xf]  ;;  %v3040_v32 = vld [vmem:[#allocation2 + $0x5ec] sm:$0xf0]  ;;  %v2575_v40 = vor.u32 %v3008_v29, %v2574_v28  ;;  %1285 = vmatpush.bf16.msra.mxu2 %v2207_v36  ;;  %v2898_v20 = vld [vmem:[#allocation2 + $0x184] sm:$0xf]  ;;  %v3212_v23 = vor.u32 %v2845_v18, %v1936_v19 }
  0x2e   :  { %v2558_v41 = vld [vmem:[#allocation2 + $0x4c0] sm:$0xf]  ;;  %v2703_v42 = vor.u32 %v3040_v32, %v2702_v30  ;;  %v3004_v44 = vld [vmem:[#allocation2 + $0x4cc] sm:$0xf0]  ;;  %1299 = vmatpush.bf16.msra.mxu3 %v2335_v39  ;;  %v2144_v21 = vld [vmem:[#allocation2 + $0x190] sm:$0xf0] }
  0x2f   :  { %v2686_v45 = vld [vmem:[#allocation2 + $0x5c0] sm:$0xf]  ;;  %v3036_v46 = vld [vmem:[#allocation2 + $0x5cc] sm:$0xf0]  ;;  %1306 = vmatpush.bf16.msrb.mxu0 %v2575_v40  ;;  %v2559_v54 = vor.u32 %v3004_v44, %v2558_v41  ;;  %1272 = vmatmul.bf16.vlgmr.msra.gmra.mxu1 %v3195_v6  ;;  %v2147_v30 = vor.u32 %v2898_v20, %v2144_v21  ;;  %v2862_v32 = vld [vmem:[#allocation2 + $0x64] sm:$0xf] }
  0x30   :  { %v1926_v52 = vld [vmem:[%s3267_s0] sm:$0xf]  ;;  %v3000_v56 = vld [vmem:[#allocation2 + $0x4ac] sm:$0xf0]  ;;  %1320 = vmatpush.bf16.msrb.mxu1 %v2703_v42  ;;  %v2687_v58 = vor.u32 %v3036_v46, %v2686_v45  ;;  %v2894_v34 = vld [vmem:[#allocation2 + $0x164] sm:$0xf]  ;;  %v2003_v38 = vor.u32 %v2862_v32, %v2000_v33 }
  0x31   :  { %v2542_v55 = vld [vmem:[#allocation2 + $0x4a0] sm:$0xf]  ;;  %v3186_v57 = vor.u32 %v2847_v53, %v1926_v52  ;;  %1334 = vmatpush.bf16.msrb.mxu2 %v2067_v43  ;;  %v3032_v61 = vld [vmem:[#allocation2 + $0x5ac] sm:$0xf0]  ;;  %v2128_v35 = vld [vmem:[#allocation2 + $0x170] sm:$0xf0]  ;;  %1300 = vmatmul.bf16.vlgmr.msra.gmra.mxu3 %v3212_v23 }
  0x32   :  { %v2670_v60 = vld [vmem:[#allocation2 + $0x5a0] sm:$0xf]  ;;  %1348 = vmatpush.bf16.msrb.mxu3 %v2195_v47  ;;  %v2543_v7 = vor.u32 %v3000_v56, %v2542_v55  ;;  %v2996_v8 = vld [vmem:[#allocation2 + $0x48c] sm:$0xf0]  ;;  %v2131_v42 = vor.u32 %v2894_v34, %v2128_v35  ;;  %v2858_v44 = vld [vmem:[#allocation2 + $0x44] sm:$0xf] }
  0x33   :  { %1258 = vmatmul.bf16.vlgmr.msra.gmra.mxu0 %v3186_v57  ;;  %v2526_v5 = vld [vmem:[#allocation2 + $0x480] sm:$0xf]  ;;  %v3028_v10 = vld [vmem:[#allocation2 + $0x58c] sm:$0xf0]  ;;  %v2671_v11 = vor.u32 %v3032_v61, %v2670_v60  ;;  %v1984_v45 = vld [vmem:[#allocation2 + $0x50] sm:$0xf0] }
  0x34   :  { %1307 = vmatpush.bf16.msrb.mxu0 %v2559_v54  ;;  %v2654_v9 = vld [vmem:[#allocation2 + $0x580] sm:$0xf]  ;;  %1321 = vmatpush.bf16.msrb.mxu1 %v2687_v58  ;;  %v2527_v24 = vor.u32 %v2996_v8, %v2526_v5  ;;  %v2992_v28 = vld [vmem:[#allocation2 + $0x46c] sm:$0xf0]  ;;  %v2890_v46 = vld [vmem:[#allocation2 + $0x144] sm:$0xf]  ;;  %v1987_v50 = vor.u32 %v2858_v44, %v1984_v45 }
  0x35   :  { %1335 = vmatpush.bf16.msrb.mxu2 %v2051_v59  ;;  %v2848_v17 = vld [vmem:[%s3267_s0 + $0x1c] sm:$0xf0]  ;;  %v2655_v25 = vor.u32 %v3028_v10, %v2654_v9  ;;  %v3024_v31 = vld [vmem:[#allocation2 + $0x56c] sm:$0xf0]  ;;  %v2112_v47 = vld [vmem:[#allocation2 + $0x150] sm:$0xf0] }
  0x36   :  { %1349 = vmatpush.bf16.msrb.mxu3 %v2179_v63  ;;  %v3210_v22 = vor.u32 %v2848_v17, %v1934_v15  ;;  %v2510_v27 = vld [vmem:[#allocation2 + $0x460] sm:$0xf]  ;;  %v2988_v40 = vld [vmem:[#allocation2 + $0x44c] sm:$0xf0]  ;;  %v2115_v54 = vor.u32 %v2890_v46, %v2112_v47  ;;  %v2854_v56 = vld [vmem:[#allocation2 + $0x24] sm:$0xf] }
  0x37   :  { %v2638_v29 = vld [vmem:[#allocation2 + $0x560] sm:$0xf]  ;;  %v2511_v36 = vor.u32 %v2992_v28, %v2510_v27  ;;  %v3020_v43 = vld [vmem:[#allocation2 + $0x54c] sm:$0xf0]  ;;  %v1968_v58 = vld [vmem:[#allocation2 + $0x30] sm:$0xf0] }
  0x38   :  { %1308 = vmatpush.bf16.msrb.mxu0 %v2543_v7  ;;  %1322 = vmatpush.bf16.msrb.mxu1 %v2671_v11  ;;  %v2639_v37 = vor.u32 %v3024_v31, %v2638_v29  ;;  %v2494_v39 = vld [vmem:[#allocation2 + $0x440] sm:$0xf]  ;;  %v2984_v52 = vld [vmem:[#allocation2 + $0x42c] sm:$0xf0]  ;;  %v2886_v59 = vld [vmem:[#allocation2 + $0x124] sm:$0xf]  ;;  %v1971_v2 = vor.u32 %v2854_v56, %v1968_v58 }
  0x39   :  { %1336 = vmatpush.bf16.msrb.mxu2 %v2035_v12  ;;  %v2622_v41 = vld [vmem:[#allocation2 + $0x540] sm:$0xf]  ;;  %v2495_v48 = vor.u32 %v2988_v40, %v2494_v39  ;;  %v3016_v55 = vld [vmem:[#allocation2 + $0x52c] sm:$0xf0]  ;;  %v2096_v60 = vld [vmem:[#allocation2 + $0x130] sm:$0xf0] }
  0x3a   :  { %1350 = vmatpush.bf16.msrb.mxu3 %v2163_v16  ;;  %1286 = vmatmul.bf16.vlgmr.msra.gmra.mxu2 %v3210_v22  ;;  %v2623_v49 = vor.u32 %v3020_v43, %v2622_v41  ;;  %v2478_v51 = vld [vmem:[#allocation2 + $0x420] sm:$0xf]  ;;  %v2980_v63 = vld [vmem:[#allocation2 + $0x40c] sm:$0xf0]  ;;  %v2850_v4 = vld [vmem:[#allocation2 + $0x4] sm:$0xf]  ;;  %v2099_v7 = vor.u32 %v2886_v59, %v2096_v60 }
  0x3b   :  { %v2606_v53 = vld [vmem:[#allocation2 + $0x520] sm:$0xf]  ;;  %v2479_v61 = vor.u32 %v2984_v52, %v2478_v51  ;;  %v3012_v3 = vld [vmem:[#allocation2 + $0x50c] sm:$0xf0]  ;;  %v1952_v5 = vld [vmem:[#allocation2 + $0x10] sm:$0xf0] }
  0x3c   :  { %1309 = vmatpush.bf16.msrb.mxu0 %v2527_v24  ;;  %1323 = vmatpush.bf16.msrb.mxu1 %v2655_v25  ;;  %v2462_v62 = vld [vmem:[#allocation2 + $0x400] sm:$0xf]  ;;  %v2607_v1 = vor.u32 %v3016_v55, %v2606_v53  ;;  %v2882_v8 = vld [vmem:[#allocation2 + $0x104] sm:$0xf]  ;;  %v2080_v9 = vld [vmem:[#allocation2 + $0x110] sm:$0xf0]  ;;  %v1955_v19 = vor.u32 %v2850_v4, %v1952_v5 }
  0x3d   :  { %1337 = vmatpush.bf16.msrb.mxu2 %v2019_v26  ;;  %v2590_v0 = vld [vmem:[#allocation2 + $0x500] sm:$0xf]  ;;  %v2942_v10 = vld [vmem:[#allocation2 + $0x2e4] sm:$0xf]  ;;  %v2320_v11 = vld [vmem:[#allocation2 + $0x2f0] sm:$0xf0]  ;;  %v2463_v14 = vor.u32 %v2980_v63, %v2462_v62  ;;  %v2083_v25 = vor.u32 %v2882_v8, %v2080_v9 }
  0x3e   :  { %1351 = vmatpush.bf16.msrb.mxu3 %v2147_v30  ;;  %v2974_v12 = vld [vmem:[#allocation2 + $0x3e4] sm:$0xf]  ;;  %v2448_v13 = vld [vmem:[#allocation2 + $0x3f0] sm:$0xf0]  ;;  %v2591_v18 = vor.u32 %v3012_v3, %v2590_v0  ;;  %v1942_v21 = vld [vmem:[%s3267_s0 + $0x10] sm:$0xf]  ;;  %v2323_v26 = vor.u32 %v2942_v10, %v2320_v11 }
  0x3f   :  { %v3006_v15 = vld [vmem:[#allocation2 + $0x4e4] sm:$0xf]  ;;  %v2576_v16 = vld [vmem:[#allocation2 + $0x4f0] sm:$0xf0]  ;;  %v2849_v24 = vld [vmem:[%s3267_s0 + $0x24] sm:$0xf0]  ;;  %v2451_v29 = vor.u32 %v2974_v12, %v2448_v13 }
  0x40   :  { %1310 = vmatpush.bf16.msrb.mxu0 %v2511_v36  ;;  %1324 = vmatpush.bf16.msrb.mxu1 %v2639_v37  ;;  %v3038_v17 = vld [vmem:[#allocation2 + $0x5e4] sm:$0xf]  ;;  %v2704_v20 = vld [vmem:[#allocation2 + $0x5f0] sm:$0xf0]  ;;  %v1944_v28 = vld [vmem:[%s3267_s0 + $0x28] sm:$0xf0]  ;;  %v2579_v30 = vor.u32 %v3006_v15, %v2576_v16  ;;  %v3228_v35 = vor.u32 %v2849_v24, %v1942_v21 }
  0x41   :  { %1338 = vmatpush.bf16.msrb.mxu2 %v2003_v38  ;;  %v2846_v27 = vld [vmem:[%s3267_s0 + $0x14] sm:$0xf]  ;;  %v2938_v31 = vld [vmem:[#allocation2 + $0x2c4] sm:$0xf]  ;;  %v2707_v34 = vor.u32 %v3038_v17, %v2704_v20 }
  0x42   :  { %1352 = vmatpush.bf16.msrb.mxu3 %v2131_v42  ;;  %v2304_v32 = vld [vmem:[#allocation2 + $0x2d0] sm:$0xf0]  ;;  %v2970_v33 = vld [vmem:[#allocation2 + $0x3c4] sm:$0xf]  ;;  %v3230_v39 = vor.u32 %v2846_v27, %v1944_v28 }
  0x43   :  { %v2432_v36 = vld [vmem:[#allocation2 + $0x3d0] sm:$0xf0]  ;;  %v3002_v37 = vld [vmem:[#allocation2 + $0x4c4] sm:$0xf]  ;;  %v2307_v42 = vor.u32 %v2938_v31, %v2304_v32 }
  0x44   :  { %1311 = vmatpush.bf16.msrb.mxu0 %v2495_v48  ;;  %1325 = vmatpush.bf16.msrb.mxu1 %v2623_v49  ;;  %v2560_v38 = vld [vmem:[#allocation2 + $0x4d0] sm:$0xf0]  ;;  %v3034_v40 = vld [vmem:[#allocation2 + $0x5c4] sm:$0xf]  ;;  %v2435_v43 = vor.u32 %v2970_v33, %v2432_v36 }
  0x45   :  { %1339 = vmatpush.bf16.msrb.mxu2 %v1987_v50  ;;  %v2688_v41 = vld [vmem:[#allocation2 + $0x5d0] sm:$0xf0]  ;;  %v2563_v44 = vor.u32 %v3002_v37, %v2560_v38  ;;  %v2934_v45 = vld [vmem:[#allocation2 + $0x2a4] sm:$0xf] }
  0x46   :  { %1353 = vmatpush.bf16.msrb.mxu3 %v2115_v54  ;;  %v2288_v46 = vld [vmem:[#allocation2 + $0x2b0] sm:$0xf0]  ;;  %v2966_v47 = vld [vmem:[#allocation2 + $0x3a4] sm:$0xf]  ;;  %v2691_v48 = vor.u32 %v3034_v40, %v2688_v41 }
  0x47   :  { %v2416_v49 = vld [vmem:[#allocation2 + $0x3b0] sm:$0xf0]  ;;  %v2998_v50 = vld [vmem:[#allocation2 + $0x4a4] sm:$0xf]  ;;  %v2291_v54 = vor.u32 %v2934_v45, %v2288_v46 }
  0x48   :  { %1312 = vmatpush.bf16.msrb.mxu0 %v2479_v61  ;;  %1326 = vmatpush.bf16.msrb.mxu1 %v2607_v1  ;;  %v2544_v51 = vld [vmem:[#allocation2 + $0x4b0] sm:$0xf0]  ;;  %v3030_v52 = vld [vmem:[#allocation2 + $0x5a4] sm:$0xf]  ;;  %v2419_v55 = vor.u32 %v2966_v47, %v2416_v49 }
  0x49   :  { %1340 = vmatpush.bf16.msrb.mxu2 %v1971_v2  ;;  %v2672_v53 = vld [vmem:[#allocation2 + $0x5b0] sm:$0xf0]  ;;  %v2547_v56 = vor.u32 %v2998_v50, %v2544_v51  ;;  %v2930_v58 = vld [vmem:[#allocation2 + $0x284] sm:$0xf] }
  0x4a   :  { %1354 = vmatpush.bf16.msrb.mxu3 %v2099_v7  ;;  %v2272_v59 = vld [vmem:[#allocation2 + $0x290] sm:$0xf0]  ;;  %v2962_v60 = vld [vmem:[#allocation2 + $0x384] sm:$0xf]  ;;  %v2675_v61 = vor.u32 %v3030_v52, %v2672_v53 }
  0x4b   :  { %v2400_v62 = vld [vmem:[#allocation2 + $0x390] sm:$0xf0]  ;;  %v2994_v63 = vld [vmem:[#allocation2 + $0x484] sm:$0xf]  ;;  %v2275_v3 = vor.u32 %v2930_v58, %v2272_v59  ;;  %v2881_v58 = vld [vmem:[#allocation2 + $0xf4] sm:$0xf0] }
  0x4c   :  { %1313 = vmatpush.bf16.msrb.mxu0 %v2463_v14  ;;  %1327 = vmatpush.bf16.msrb.mxu1 %v2591_v18  ;;  %v2528_v0 = vld [vmem:[#allocation2 + $0x490] sm:$0xf0]  ;;  %v3026_v1 = vld [vmem:[#allocation2 + $0x584] sm:$0xf]  ;;  %v2403_v4 = vor.u32 %v2962_v60, %v2400_v62  ;;  %v2198_v59 = vld [vmem:[#allocation2 + $0x1e8] sm:$0xf] }
  0x4d   :  { %1341 = vmatpush.bf16.msrb.mxu2 %v1955_v19  ;;  %v2656_v2 = vld [vmem:[#allocation2 + $0x590] sm:$0xf0]  ;;  %v2531_v5 = vor.u32 %v2994_v63, %v2528_v0  ;;  %v2926_v7 = vld [vmem:[#allocation2 + $0x264] sm:$0xf]  ;;  %v2326_v62 = vld [vmem:[#allocation2 + $0x2e8] sm:$0xf] }
  0x4e   :  { %1355 = vmatpush.bf16.msrb.mxu3 %v2083_v25  ;;  %v2256_v8 = vld [vmem:[#allocation2 + $0x270] sm:$0xf0]  ;;  %v2958_v9 = vld [vmem:[#allocation2 + $0x364] sm:$0xf]  ;;  %v2659_v10 = vor.u32 %v3026_v1, %v2656_v2  ;;  %v2945_v63 = vld [vmem:[#allocation2 + $0x2f4] sm:$0xf0] }
  0x4f   :  { %1314 = vmatmul.bf16.vlgmr.msrb.gmra.mxu0 %v3228_v35  ;;  %1328 = vmatmul.bf16.vlgmr.msrb.gmra.mxu1 %v3230_v39  ;;  %v2384_v11 = vld [vmem:[#allocation2 + $0x370] sm:$0xf0]  ;;  %v2990_v12 = vld [vmem:[#allocation2 + $0x464] sm:$0xf]  ;;  %v2259_v16 = vor.u32 %v2926_v7, %v2256_v8  ;;  %v2454_v2 = vld [vmem:[#allocation2 + $0x3e8] sm:$0xf]  ;;  %v2327_v8 = vor.u32 %v2945_v63, %v2326_v62 }
  0x50   :  { %1362 = vmatpush.bf16.msra.mxu0 %v2323_v26  ;;  %1376 = vmatpush.bf16.msra.mxu1 %v2451_v29  ;;  %v2512_v13 = vld [vmem:[#allocation2 + $0x470] sm:$0xf0]  ;;  %v3022_v14 = vld [vmem:[#allocation2 + $0x564] sm:$0xf]  ;;  %v2387_v17 = vor.u32 %v2958_v9, %v2384_v11  ;;  %v2054_v9 = vld [vmem:[#allocation2 + $0xc8] sm:$0xf] }
  0x51   :  { %1390 = vmatpush.bf16.msra.mxu2 %v2579_v30  ;;  %1356 = vmatmul.bf16.vlgmr.msrb.gmra.mxu3 %v3195_v6  ;;  %v2640_v15 = vld [vmem:[#allocation2 + $0x570] sm:$0xf0]  ;;  %v2515_v18 = vor.u32 %v2990_v12, %v2512_v13  ;;  %v2922_v19 = vld [vmem:[#allocation2 + $0x244] sm:$0xf]  ;;  %v2182_v11 = vld [vmem:[#allocation2 + $0x1c8] sm:$0xf] }
  0x52   :  { %1404 = vmatpush.bf16.msra.mxu3 %v2707_v34  ;;  %1342 = vmatmul.bf16.vlgmr.msrb.gmra.mxu2 %v3186_v57  ;;  %v2240_v20 = vld [vmem:[#allocation2 + $0x250] sm:$0xf0]  ;;  %v2954_v21 = vld [vmem:[#allocation2 + $0x344] sm:$0xf]  ;;  %v2643_v24 = vor.u32 %v3022_v14, %v2640_v15  ;;  %v2909_v13 = vld [vmem:[#allocation2 + $0x1d4] sm:$0xf0] }
  0x53   :  { %v2368_v25 = vld [vmem:[#allocation2 + $0x350] sm:$0xf0]  ;;  %v2986_v26 = vld [vmem:[#allocation2 + $0x444] sm:$0xf]  ;;  %v2243_v30 = vor.u32 %v2922_v19, %v2240_v20  ;;  %v2310_v14 = vld [vmem:[#allocation2 + $0x2c8] sm:$0xf]  ;;  %v2183_v19 = vor.u32 %v2909_v13, %v2182_v11 }
  0x54   :  { %1363 = vmatpush.bf16.msra.mxu0 %v2307_v42  ;;  %1377 = vmatpush.bf16.msra.mxu1 %v2435_v43  ;;  %v2496_v27 = vld [vmem:[#allocation2 + $0x450] sm:$0xf0]  ;;  %v3018_v28 = vld [vmem:[#allocation2 + $0x544] sm:$0xf]  ;;  %v2371_v31 = vor.u32 %v2954_v21, %v2368_v25  ;;  %v2941_v15 = vld [vmem:[#allocation2 + $0x2d4] sm:$0xf0] }
  0x55   :  { %1391 = vmatpush.bf16.msra.mxu2 %v2563_v44  ;;  %v2624_v29 = vld [vmem:[#allocation2 + $0x550] sm:$0xf0]  ;;  %v2499_v32 = vor.u32 %v2986_v26, %v2496_v27  ;;  %v2918_v33 = vld [vmem:[#allocation2 + $0x224] sm:$0xf]  ;;  %v2311_v20 = vor.u32 %v2941_v15, %v2310_v14  ;;  %v2038_v21 = vld [vmem:[#allocation2 + $0xa8] sm:$0xf] }
  0x56   :  { %1405 = vmatpush.bf16.msra.mxu3 %v2691_v48  ;;  %v2224_v34 = vld [vmem:[#allocation2 + $0x230] sm:$0xf0]  ;;  %v2950_v36 = vld [vmem:[#allocation2 + $0x324] sm:$0xf]  ;;  %v2627_v37 = vor.u32 %v3018_v28, %v2624_v29  ;;  %v2166_v25 = vld [vmem:[#allocation2 + $0x1a8] sm:$0xf] }
  0x57   :  { %v2352_v38 = vld [vmem:[#allocation2 + $0x330] sm:$0xf0]  ;;  %v2982_v40 = vld [vmem:[#allocation2 + $0x424] sm:$0xf]  ;;  %v2227_v44 = vor.u32 %v2918_v33, %v2224_v34  ;;  %v2905_v27 = vld [vmem:[#allocation2 + $0x1b4] sm:$0xf0] }
  0x58   :  { %1364 = vmatpush.bf16.msra.mxu0 %v2291_v54  ;;  %1378 = vmatpush.bf16.msra.mxu1 %v2419_v55  ;;  %v2480_v41 = vld [vmem:[#allocation2 + $0x430] sm:$0xf0]  ;;  %v3014_v42 = vld [vmem:[#allocation2 + $0x524] sm:$0xf]  ;;  %v2355_v48 = vor.u32 %v2950_v36, %v2352_v38  ;;  %v2294_v28 = vld [vmem:[#allocation2 + $0x2a8] sm:$0xf]  ;;  %v2167_v33 = vor.u32 %v2905_v27, %v2166_v25 }
  0x59   :  { %1392 = vmatpush.bf16.msra.mxu2 %v2547_v56  ;;  %v2608_v43 = vld [vmem:[#allocation2 + $0x530] sm:$0xf0]  ;;  %v2914_v45 = vld [vmem:[#allocation2 + $0x204] sm:$0xf]  ;;  %v2483_v49 = vor.u32 %v2982_v40, %v2480_v41  ;;  %v2070_v56 = vld [vmem:[#allocation2 + $0xe8] sm:$0xf] }
  0x5a   :  { %1406 = vmatpush.bf16.msra.mxu3 %v2675_v61  ;;  %v2208_v46 = vld [vmem:[#allocation2 + $0x210] sm:$0xf0]  ;;  %v2946_v47 = vld [vmem:[#allocation2 + $0x304] sm:$0xf]  ;;  %v2611_v53 = vor.u32 %v3014_v42, %v2608_v43  ;;  %v2913_v61 = vld [vmem:[#allocation2 + $0x1f4] sm:$0xf0] }
  0x5b   :  { %v2336_v50 = vld [vmem:[#allocation2 + $0x310] sm:$0xf0]  ;;  %v2978_v51 = vld [vmem:[#allocation2 + $0x404] sm:$0xf]  ;;  %v2211_v60 = vor.u32 %v2914_v45, %v2208_v46  ;;  %v2199_v7 = vor.u32 %v2913_v61, %v2198_v59  ;;  %v2937_v29 = vld [vmem:[#allocation2 + $0x2b4] sm:$0xf0] }
  0x5c   :  { %1365 = vmatpush.bf16.msra.mxu0 %v2275_v3  ;;  %1379 = vmatpush.bf16.msra.mxu1 %v2403_v4  ;;  %v2464_v52 = vld [vmem:[#allocation2 + $0x410] sm:$0xf0]  ;;  %v3010_v54 = vld [vmem:[#allocation2 + $0x504] sm:$0xf]  ;;  %v2339_v0 = vor.u32 %v2946_v47, %v2336_v50  ;;  %v2977_v3 = vld [vmem:[#allocation2 + $0x3f4] sm:$0xf0]  ;;  %v2295_v34 = vor.u32 %v2937_v29, %v2294_v28 }
  0x5d   :  { %1393 = vmatpush.bf16.msra.mxu2 %v2531_v5  ;;  %v2592_v55 = vld [vmem:[#allocation2 + $0x510] sm:$0xf0]  ;;  %v2467_v1 = vor.u32 %v2978_v51, %v2464_v52  ;;  %v2071_v5 = vor.u32 %v2881_v58, %v2070_v56  ;;  %v2455_v12 = vor.u32 %v2977_v3, %v2454_v2  ;;  %v2022_v36 = vld [vmem:[#allocation2 + $0x88] sm:$0xf]  ;;  %v2901_v41 = vld [vmem:[#allocation2 + $0x194] sm:$0xf0] }
  0x5e   :  { %1407 = vmatpush.bf16.msra.mxu3 %v2659_v10  ;;  %v2595_v4 = vor.u32 %v3010_v54, %v2592_v55  ;;  %v2877_v10 = vld [vmem:[#allocation2 + $0xd4] sm:$0xf0]  ;;  %v2150_v38 = vld [vmem:[#allocation2 + $0x188] sm:$0xf] }
  0x5f   :  { %v2278_v42 = vld [vmem:[#allocation2 + $0x288] sm:$0xf]  ;;  %v2933_v43 = vld [vmem:[#allocation2 + $0x294] sm:$0xf0]  ;;  %v2151_v47 = vor.u32 %v2901_v41, %v2150_v38  ;;  %v2879_v41 = vld [vmem:[#allocation2 + $0xec] sm:$0xf] }
  0x60   :  { %1366 = vmatpush.bf16.msra.mxu0 %v2259_v16  ;;  %1380 = vmatpush.bf16.msra.mxu1 %v2387_v17  ;;  %v2438_v16 = vld [vmem:[#allocation2 + $0x3c8] sm:$0xf]  ;;  %v2973_v17 = vld [vmem:[#allocation2 + $0x3d4] sm:$0xf0] }
  0x61   :  { %1394 = vmatpush.bf16.msra.mxu2 %v2515_v18  ;;  %v2055_v18 = vor.u32 %v2877_v10, %v2054_v9  ;;  %v2439_v26 = vor.u32 %v2973_v17, %v2438_v16  ;;  %v2965_v45 = vld [vmem:[#allocation2 + $0x394] sm:$0xf0]  ;;  %v2134_v51 = vld [vmem:[#allocation2 + $0x168] sm:$0xf] }
  0x62   :  { %1408 = vmatpush.bf16.msra.mxu3 %v2643_v24  ;;  %v2873_v24 = vld [vmem:[#allocation2 + $0xb4] sm:$0xf0]  ;;  %v2262_v54 = vld [vmem:[#allocation2 + $0x268] sm:$0xf] }
  0x63   :  { %v2865_v50 = vld [vmem:[#allocation2 + $0x74] sm:$0xf0]  ;;  %v2390_v56 = vld [vmem:[#allocation2 + $0x368] sm:$0xf] }
  0x64   :  { %1367 = vmatpush.bf16.msra.mxu0 %v2243_v30  ;;  %1381 = vmatpush.bf16.msra.mxu1 %v2371_v31  ;;  %v2422_v30 = vld [vmem:[#allocation2 + $0x3a8] sm:$0xf]  ;;  %v2969_v31 = vld [vmem:[#allocation2 + $0x3b4] sm:$0xf0] }
  0x65   :  { %1395 = vmatpush.bf16.msra.mxu2 %v2499_v32  ;;  %v2039_v32 = vor.u32 %v2873_v24, %v2038_v21  ;;  %v2423_v40 = vor.u32 %v2969_v31, %v2422_v30  ;;  %v2929_v55 = vld [vmem:[#allocation2 + $0x274] sm:$0xf0]  ;;  %v1990_v62 = vld [vmem:[#allocation2 + $0x48] sm:$0xf] }
  0x66   :  { %1409 = vmatpush.bf16.msra.mxu3 %v2627_v37  ;;  %v2869_v37 = vld [vmem:[#allocation2 + $0x94] sm:$0xf0]  ;;  %v2263_v61 = vor.u32 %v2929_v55, %v2262_v54  ;;  %v2246_v3 = vld [vmem:[#allocation2 + $0x248] sm:$0xf] }
  0x67   :  { %v2023_v46 = vor.u32 %v2869_v37, %v2022_v36  ;;  %v2961_v58 = vld [vmem:[#allocation2 + $0x374] sm:$0xf0]  ;;  %v1974_v11 = vld [vmem:[#allocation2 + $0x28] sm:$0xf] }
  0x68   :  { %1368 = vmatpush.bf16.msra.mxu0 %v2227_v44  ;;  %1382 = vmatpush.bf16.msra.mxu1 %v2355_v48  ;;  %v2406_v44 = vld [vmem:[#allocation2 + $0x388] sm:$0xf]  ;;  %v2279_v48 = vor.u32 %v2933_v43, %v2278_v42  ;;  %v2861_v63 = vld [vmem:[#allocation2 + $0x54] sm:$0xf0]  ;;  %v2072_v42 = vld [vmem:[#allocation2 + $0xf8] sm:$0xf0] }
  0x69   :  { %1396 = vmatpush.bf16.msra.mxu2 %v2483_v49  ;;  %v2006_v49 = vld [vmem:[#allocation2 + $0x68] sm:$0xf]  ;;  %v2407_v52 = vor.u32 %v2965_v45, %v2406_v44  ;;  %v2893_v2 = vld [vmem:[#allocation2 + $0x154] sm:$0xf0]  ;;  %v2911_v45 = vld [vmem:[#allocation2 + $0x1ec] sm:$0xf] }
  0x6a   :  { %1410 = vmatpush.bf16.msra.mxu3 %v2611_v53  ;;  %v2897_v53 = vld [vmem:[#allocation2 + $0x174] sm:$0xf0]  ;;  %v2007_v59 = vor.u32 %v2865_v50, %v2006_v49  ;;  %v2102_v13 = vld [vmem:[#allocation2 + $0x128] sm:$0xf]  ;;  %v2075_v50 = vor.u32 %v2879_v41, %v2072_v42 }
  0x6b   :  { %v2889_v15 = vld [vmem:[#allocation2 + $0x134] sm:$0xf0]  ;;  %v2230_v16 = vld [vmem:[#allocation2 + $0x228] sm:$0xf] }
  0x6c   :  { %1369 = vmatpush.bf16.msra.mxu0 %v2211_v60  ;;  %1383 = vmatpush.bf16.msra.mxu1 %v2339_v0  ;;  %v2135_v60 = vor.u32 %v2897_v53, %v2134_v51  ;;  %v2118_v0 = vld [vmem:[#allocation2 + $0x148] sm:$0xf]  ;;  %v2921_v17 = vld [vmem:[#allocation2 + $0x234] sm:$0xf0]  ;;  %v2103_v25 = vor.u32 %v2889_v15, %v2102_v13 }
  0x6d   :  { %1397 = vmatpush.bf16.msra.mxu2 %v2467_v1  ;;  %v2391_v1 = vor.u32 %v2961_v58, %v2390_v56  ;;  %v2119_v9 = vor.u32 %v2893_v2, %v2118_v0  ;;  %v1958_v21 = vld [vmem:[#allocation2 + $0x8] sm:$0xf]  ;;  %v2853_v24 = vld [vmem:[#allocation2 + $0x14] sm:$0xf0]  ;;  %v2875_v56 = vld [vmem:[#allocation2 + $0xcc] sm:$0xf] }
  0x6e   :  { %1411 = vmatpush.bf16.msra.mxu3 %v2595_v4  ;;  %v2925_v4 = vld [vmem:[#allocation2 + $0x254] sm:$0xf0]  ;;  %v2086_v27 = vld [vmem:[#allocation2 + $0x108] sm:$0xf]  ;;  %v1959_v38 = vor.u32 %v2853_v24, %v1958_v21  ;;  %v2056_v58 = vld [vmem:[#allocation2 + $0xd8] sm:$0xf0] }
  0x6f   :  { %1370 = vmatmul.bf16.vlgmr.msra.gmra.mxu0 %v3210_v22  ;;  %1384 = vmatmul.bf16.vlgmr.msra.gmra.mxu1 %v3212_v23  ;;  %v2247_v10 = vor.u32 %v2925_v4, %v2246_v3  ;;  %v2885_v28 = vld [vmem:[#allocation2 + $0x114] sm:$0xf0]  ;;  %v2214_v29 = vld [vmem:[#allocation2 + $0x208] sm:$0xf]  ;;  %v2152_v21 = vld [vmem:[#allocation2 + $0x198] sm:$0xf0] }
  0x70   :  { %1418 = vmatpush.bf16.msrb.mxu0 %v2071_v5  ;;  %1432 = vmatpush.bf16.msrb.mxu1 %v2199_v7  ;;  %v2374_v5 = vld [vmem:[#allocation2 + $0x348] sm:$0xf]  ;;  %v2957_v7 = vld [vmem:[#allocation2 + $0x354] sm:$0xf0]  ;;  %v2087_v43 = vor.u32 %v2885_v28, %v2086_v27 }
  0x71   :  { %1446 = vmatpush.bf16.msrb.mxu2 %v2327_v8  ;;  %1412 = vmatmul.bf16.vlgmr.msra.gmra.mxu3 %v3230_v39  ;;  %v1991_v8 = vor.u32 %v2861_v63, %v1990_v62  ;;  %v2375_v14 = vor.u32 %v2957_v7, %v2374_v5  ;;  %v2917_v31 = vld [vmem:[#allocation2 + $0x214] sm:$0xf0]  ;;  %v2710_v37 = vld [vmem:[#allocation2 + $0x5e8] sm:$0xf]  ;;  %v2059_v63 = vor.u32 %v2875_v56, %v2056_v58  ;;  %v2871_v5 = vld [vmem:[#allocation2 + $0xac] sm:$0xf] }
  0x72   :  { %1460 = vmatpush.bf16.msrb.mxu3 %v2455_v12  ;;  %1398 = vmatmul.bf16.vlgmr.msra.gmra.mxu2 %v3228_v35  ;;  %v2857_v12 = vld [vmem:[#allocation2 + $0x34] sm:$0xf0]  ;;  %v2215_v44 = vor.u32 %v2917_v31, %v2214_v29  ;;  %v2566_v51 = vld [vmem:[#allocation2 + $0x4c8] sm:$0xf]  ;;  %v2040_v7 = vld [vmem:[#allocation2 + $0xb8] sm:$0xf0] }
  0x73   :  { %v3009_v36 = vld [vmem:[#allocation2 + $0x4f4] sm:$0xf0]  ;;  %v2694_v53 = vld [vmem:[#allocation2 + $0x5c8] sm:$0xf] }
  0x74   :  { %1419 = vmatpush.bf16.msrb.mxu0 %v2055_v18  ;;  %1433 = vmatpush.bf16.msrb.mxu1 %v2183_v19  ;;  %v2358_v18 = vld [vmem:[#allocation2 + $0x328] sm:$0xf]  ;;  %v2953_v19 = vld [vmem:[#allocation2 + $0x334] sm:$0xf0] }
  0x75   :  { %1447 = vmatpush.bf16.msrb.mxu2 %v2311_v20  ;;  %v1975_v20 = vor.u32 %v2857_v12, %v1974_v11  ;;  %v2359_v30 = vor.u32 %v2953_v19, %v2358_v18  ;;  %v3037_v55 = vld [vmem:[#allocation2 + $0x5d4] sm:$0xf0]  ;;  %v2550_v0 = vld [vmem:[#allocation2 + $0x4a8] sm:$0xf]  ;;  %v2043_v12 = vor.u32 %v2871_v5, %v2040_v7  ;;  %v2867_v18 = vld [vmem:[#allocation2 + $0x8c] sm:$0xf] }
  0x76   :  { %1461 = vmatpush.bf16.msrb.mxu3 %v2439_v26  ;;  %v2231_v26 = vor.u32 %v2921_v17, %v2230_v16  ;;  %v2695_v62 = vor.u32 %v3037_v55, %v2694_v53  ;;  %v2678_v2 = vld [vmem:[#allocation2 + $0x5a8] sm:$0xf]  ;;  %v3033_v4 = vld [vmem:[#allocation2 + $0x5b4] sm:$0xf0]  ;;  %v2024_v19 = vld [vmem:[#allocation2 + $0x98] sm:$0xf0] }
  0x77   :  { %v2679_v11 = vor.u32 %v3033_v4, %v2678_v2  ;;  %v2534_v13 = vld [vmem:[#allocation2 + $0x488] sm:$0xf]  ;;  %v3029_v17 = vld [vmem:[#allocation2 + $0x594] sm:$0xf0]  ;;  %v2851_v7 = vld [vmem:[#allocation2 + $0xc] sm:$0xf] }
  0x78   :  { %1420 = vmatpush.bf16.msrb.mxu0 %v2039_v32  ;;  %1434 = vmatpush.bf16.msrb.mxu1 %v2167_v33  ;;  %v2342_v32 = vld [vmem:[#allocation2 + $0x308] sm:$0xf]  ;;  %v2949_v33 = vld [vmem:[#allocation2 + $0x314] sm:$0xf0] }
  0x79   :  { %1448 = vmatpush.bf16.msrb.mxu2 %v2295_v34  ;;  %v2582_v34 = vld [vmem:[#allocation2 + $0x4e8] sm:$0xf]  ;;  %v2993_v28 = vld [vmem:[#allocation2 + $0x474] sm:$0xf0] }
  0x7a   :  { %1462 = vmatpush.bf16.msrb.mxu3 %v2423_v40  ;;  %v3041_v40 = vld [vmem:[#allocation2 + $0x5f4] sm:$0xf0]  ;;  %v2662_v15 = vld [vmem:[#allocation2 + $0x588] sm:$0xf] }
  0x7b   :  { %v2711_v49 = vor.u32 %v3041_v40, %v2710_v37  ;;  %v2518_v27 = vld [vmem:[#allocation2 + $0x468] sm:$0xf]  ;;  %v3025_v31 = vld [vmem:[#allocation2 + $0x574] sm:$0xf0] }
  0x7c   :  { %1421 = vmatpush.bf16.msrb.mxu0 %v2023_v46  ;;  %1435 = vmatpush.bf16.msrb.mxu1 %v2151_v47  ;;  %v2200_v46 = vld [vmem:[#allocation2 + $0x1f8] sm:$0xf0]  ;;  %v2343_v47 = vor.u32 %v2949_v33, %v2342_v32  ;;  %v2646_v29 = vld [vmem:[#allocation2 + $0x568] sm:$0xf]  ;;  %v2863_v32 = vld [vmem:[#allocation2 + $0x6c] sm:$0xf]  ;;  %v2519_v37 = vor.u32 %v2993_v28, %v2518_v27 }
  0x7d   :  { %1449 = vmatpush.bf16.msrb.mxu2 %v2279_v48  ;;  %v2583_v48 = vor.u32 %v3009_v36, %v2582_v34  ;;  %v2203_v54 = vor.u32 %v2911_v45, %v2200_v46  ;;  %v2008_v33 = vld [vmem:[#allocation2 + $0x78] sm:$0xf0]  ;;  %v2895_v34 = vld [vmem:[#allocation2 + $0x16c] sm:$0xf]  ;;  %v2502_v41 = vld [vmem:[#allocation2 + $0x448] sm:$0xf] }
  0x7e   :  { %1463 = vmatpush.bf16.msrb.mxu3 %v2407_v52  ;;  %v3005_v52 = vld [vmem:[#allocation2 + $0x4d4] sm:$0xf0]  ;;  %v2136_v36 = vld [vmem:[#allocation2 + $0x178] sm:$0xf0]  ;;  %v2011_v40 = vor.u32 %v2863_v32, %v2008_v33  ;;  %v2859_v46 = vld [vmem:[#allocation2 + $0x4c] sm:$0xf] }
  0x7f   :  { %v2989_v42 = vld [vmem:[#allocation2 + $0x454] sm:$0xf0]  ;;  %v2486_v53 = vld [vmem:[#allocation2 + $0x428] sm:$0xf]  ;;  %v2440_v33 = vld [vmem:[#allocation2 + $0x3d8] sm:$0xf0] }
  0x80   :  { %1422 = vmatpush.bf16.msrb.mxu0 %v2007_v59  ;;  %1436 = vmatpush.bf16.msrb.mxu1 %v2135_v60  ;;  %v2907_v59 = vld [vmem:[#allocation2 + $0x1cc] sm:$0xf]  ;;  %v2184_v60 = vld [vmem:[#allocation2 + $0x1d8] sm:$0xf0]  ;;  %v3021_v45 = vld [vmem:[#allocation2 + $0x554] sm:$0xf0] }
  0x81   :  { %1450 = vmatpush.bf16.msrb.mxu2 %v2263_v61  ;;  %v2567_v61 = vor.u32 %v3005_v52, %v2566_v51  ;;  %v2187_v3 = vor.u32 %v2907_v59, %v2184_v60  ;;  %v2614_v55 = vld [vmem:[#allocation2 + $0x528] sm:$0xf]  ;;  %v3017_v58 = vld [vmem:[#allocation2 + $0x534] sm:$0xf0]  ;;  %v2855_v59 = vld [vmem:[#allocation2 + $0x2c] sm:$0xf] }
  0x82   :  { %1464 = vmatpush.bf16.msrb.mxu3 %v2391_v1  ;;  %v3001_v1 = vld [vmem:[#allocation2 + $0x4b4] sm:$0xf0]  ;;  %v1976_v60 = vld [vmem:[#allocation2 + $0x38] sm:$0xf0]  ;;  %v2615_v2 = vor.u32 %v3017_v58, %v2614_v55  ;;  %v2598_v4 = vld [vmem:[#allocation2 + $0x508] sm:$0xf] }
  0x83   :  { %v3013_v5 = vld [vmem:[#allocation2 + $0x514] sm:$0xf0]  ;;  %v2931_v55 = vld [vmem:[#allocation2 + $0x28c] sm:$0xf] }
  0x84   :  { %1423 = vmatpush.bf16.msrb.mxu0 %v1991_v8  ;;  %1437 = vmatpush.bf16.msrb.mxu1 %v2119_v9  ;;  %v2903_v8 = vld [vmem:[#allocation2 + $0x1ac] sm:$0xf]  ;;  %v2168_v9 = vld [vmem:[#allocation2 + $0x1b8] sm:$0xf0] }
  0x85   :  { %1451 = vmatpush.bf16.msrb.mxu2 %v2247_v10  ;;  %v2551_v10 = vor.u32 %v3001_v1, %v2550_v0  ;;  %v2171_v16 = vor.u32 %v2903_v8, %v2168_v9  ;;  %v2470_v0 = vld [vmem:[#allocation2 + $0x408] sm:$0xf]  ;;  %v2981_v1 = vld [vmem:[#allocation2 + $0x414] sm:$0xf0]  ;;  %v1960_v9 = vld [vmem:[#allocation2 + $0x18] sm:$0xf0] }
  0x86   :  { %1465 = vmatpush.bf16.msrb.mxu3 %v2375_v14  ;;  %v2997_v14 = vld [vmem:[#allocation2 + $0x494] sm:$0xf0]  ;;  %v2963_v58 = vld [vmem:[#allocation2 + $0x38c] sm:$0xf] }
  0x87   :  { %v2535_v24 = vor.u32 %v2997_v14, %v2534_v13  ;;  %v2328_v13 = vld [vmem:[#allocation2 + $0x2f8] sm:$0xf0]  ;;  %v2975_v14 = vld [vmem:[#allocation2 + $0x3ec] sm:$0xf] }
  0x88   :  { %1424 = vmatpush.bf16.msrb.mxu0 %v1975_v20  ;;  %1438 = vmatpush.bf16.msrb.mxu1 %v2103_v25  ;;  %v2899_v20 = vld [vmem:[#allocation2 + $0x18c] sm:$0xf]  ;;  %v2663_v25 = vor.u32 %v3029_v17, %v2662_v15  ;;  %v2471_v15 = vor.u32 %v2981_v1, %v2470_v0 }
  0x89   :  { %1452 = vmatpush.bf16.msrb.mxu2 %v2231_v26  ;;  %v2027_v26 = vor.u32 %v2867_v18, %v2024_v19  ;;  %v3007_v17 = vld [vmem:[#allocation2 + $0x4ec] sm:$0xf]  ;;  %v2584_v18 = vld [vmem:[#allocation2 + $0x4f8] sm:$0xf0]  ;;  %v2599_v19 = vor.u32 %v3013_v5, %v2598_v4 }
  0x8a   :  { %1466 = vmatpush.bf16.msrb.mxu3 %v2359_v30  ;;  %v2155_v30 = vor.u32 %v2899_v20, %v2152_v21  ;;  %v1963_v20 = vor.u32 %v2851_v7, %v1960_v9  ;;  %v3039_v21 = vld [vmem:[#allocation2 + $0x5ec] sm:$0xf]  ;;  %v2587_v28 = vor.u32 %v3007_v17, %v2584_v18  ;;  %v2392_v7 = vld [vmem:[#allocation2 + $0x378] sm:$0xf0] }
  0x8b   :  { %v2959_v4 = vld [vmem:[#allocation2 + $0x36c] sm:$0xf]  ;;  %v2520_v9 = vld [vmem:[#allocation2 + $0x478] sm:$0xf0] }
  0x8c   :  { %1425 = vmatpush.bf16.msrb.mxu0 %v1959_v38  ;;  %1439 = vmatpush.bf16.msrb.mxu1 %v2087_v43  ;;  %v2647_v38 = vor.u32 %v3025_v31, %v2646_v29  ;;  %v2630_v43 = vld [vmem:[#allocation2 + $0x548] sm:$0xf]  ;;  %v2939_v29 = vld [vmem:[#allocation2 + $0x2cc] sm:$0xf] }
  0x8d   :  { %1453 = vmatpush.bf16.msrb.mxu2 %v2215_v44  ;;  %v2139_v44 = vor.u32 %v2895_v34, %v2136_v36  ;;  %v2631_v51 = vor.u32 %v3021_v45, %v2630_v43  ;;  %v2971_v31 = vld [vmem:[#allocation2 + $0x3cc] sm:$0xf]  ;;  %v2568_v36 = vld [vmem:[#allocation2 + $0x4d8] sm:$0xf0] }
  0x8e   :  { %1467 = vmatpush.bf16.msrb.mxu3 %v2343_v47  ;;  %v1992_v47 = vld [vmem:[#allocation2 + $0x58] sm:$0xf0]  ;;  %v3003_v34 = vld [vmem:[#allocation2 + $0x4cc] sm:$0xf] }
  0x8f   :  { %1426 = vmatmul.bf16.vlgmr.msrb.gmra.mxu0 %v3186_v57  ;;  %1440 = vmatmul.bf16.vlgmr.msrb.gmra.mxu1 %v3195_v6  ;;  %v1995_v52 = vor.u32 %v2859_v46, %v1992_v47  ;;  %v2935_v43 = vld [vmem:[#allocation2 + $0x2ac] sm:$0xf]  ;;  %v2424_v47 = vld [vmem:[#allocation2 + $0x3b8] sm:$0xf0] }
  0x90   :  { %1474 = vmatpush.bf16.msra.mxu0 %v2583_v48  ;;  %1488 = vmatpush.bf16.msra.mxu1 %v2711_v49  ;;  %v2891_v48 = vld [vmem:[#allocation2 + $0x14c] sm:$0xf]  ;;  %v2120_v49 = vld [vmem:[#allocation2 + $0x158] sm:$0xf0] }
  0x91   :  { %1502 = vmatpush.bf16.msra.mxu2 %v2075_v50  ;;  %1468 = vmatmul.bf16.vlgmr.msrb.gmra.mxu3 %v3212_v23  ;;  %v2503_v50 = vor.u32 %v2989_v42, %v2502_v41  ;;  %v2123_v56 = vor.u32 %v2891_v48, %v2120_v49  ;;  %v2443_v41 = vor.u32 %v2971_v31, %v2440_v33  ;;  %v2967_v45 = vld [vmem:[#allocation2 + $0x3ac] sm:$0xf]  ;;  %v2552_v49 = vld [vmem:[#allocation2 + $0x4b8] sm:$0xf0] }
  0x92   :  { %1516 = vmatpush.bf16.msra.mxu3 %v2203_v54  ;;  %1454 = vmatmul.bf16.vlgmr.msrb.gmra.mxu2 %v3210_v22  ;;  %v2985_v54 = vld [vmem:[#allocation2 + $0x434] sm:$0xf0]  ;;  %v2571_v42 = vor.u32 %v3003_v34, %v2568_v36  ;;  %v2999_v48 = vld [vmem:[#allocation2 + $0x4ac] sm:$0xf]  ;;  %v2232_v31 = vld [vmem:[#allocation2 + $0x238] sm:$0xf0] }
  0x93   :  { %v2955_v17 = vld [vmem:[#allocation2 + $0x34c] sm:$0xf]  ;;  %v2360_v34 = vld [vmem:[#allocation2 + $0x338] sm:$0xf0] }
  0x94   :  { %1475 = vmatpush.bf16.msra.mxu0 %v2567_v61  ;;  %1489 = vmatpush.bf16.msra.mxu1 %v2695_v62  ;;  %v2887_v61 = vld [vmem:[#allocation2 + $0x12c] sm:$0xf]  ;;  %v2104_v62 = vld [vmem:[#allocation2 + $0x138] sm:$0xf0] }
  0x95   :  { %1503 = vmatpush.bf16.msra.mxu2 %v2059_v63  ;;  %v2487_v63 = vor.u32 %v2985_v54, %v2486_v53  ;;  %v2107_v8 = vor.u32 %v2887_v61, %v2104_v62  ;;  %v2427_v53 = vor.u32 %v2967_v45, %v2424_v47  ;;  %v2555_v54 = vor.u32 %v2999_v48, %v2552_v49  ;;  %v2995_v61 = vld [vmem:[#allocation2 + $0x48c] sm:$0xf]  ;;  %v2536_v62 = vld [vmem:[#allocation2 + $0x498] sm:$0xf0] }
  0x96   :  { %1517 = vmatpush.bf16.msra.mxu3 %v2187_v3  ;;  %v1979_v3 = vor.u32 %v2855_v59, %v1976_v60  ;;  %v2408_v60 = vld [vmem:[#allocation2 + $0x398] sm:$0xf0]  ;;  %v2983_v36 = vld [vmem:[#allocation2 + $0x42c] sm:$0xf] }
  0x97   :  { %v2411_v1 = vor.u32 %v2963_v58, %v2408_v60  ;;  %v2915_v45 = vld [vmem:[#allocation2 + $0x20c] sm:$0xf]  ;;  %v2344_v49 = vld [vmem:[#allocation2 + $0x318] sm:$0xf0] }
  0x98   :  { %1476 = vmatpush.bf16.msra.mxu0 %v2551_v10  ;;  %1490 = vmatpush.bf16.msra.mxu1 %v2679_v11  ;;  %v2883_v10 = vld [vmem:[#allocation2 + $0x10c] sm:$0xf]  ;;  %v2088_v11 = vld [vmem:[#allocation2 + $0x118] sm:$0xf0] }
  0x99   :  { %1504 = vmatpush.bf16.msra.mxu2 %v2043_v12  ;;  %v2943_v12 = vld [vmem:[#allocation2 + $0x2ec] sm:$0xf]  ;;  %v3049_v60 = vld [vmem:[#allocation4 + $0x38] sm:$0xff] }
  0x9a   :  { %1518 = vmatpush.bf16.msra.mxu3 %v2171_v16  ;;  %v2456_v16 = vld [vmem:[#allocation2 + $0x3f8] sm:$0xf0]  ;;  %v2947_v47 = vld [vmem:[#allocation2 + $0x30c] sm:$0xf] }
  0x9b   :  { %v2459_v27 = vor.u32 %v2975_v14, %v2456_v16  ;;  %v2248_v16 = vld [vmem:[#allocation2 + $0x258] sm:$0xf0] }
  0x9c   :  { %1477 = vmatpush.bf16.msra.mxu0 %v2535_v24  ;;  %1491 = vmatpush.bf16.msra.mxu1 %v2663_v25  ;;  %v2712_v24 = vld [vmem:[#allocation2 + $0x5f8] sm:$0xf0]  ;;  %v2091_v25 = vor.u32 %v2883_v10, %v2088_v11  ;;  %v3023_v10 = vld [vmem:[#allocation2 + $0x56c] sm:$0xf] }
  0x9d   :  { %1505 = vmatpush.bf16.msra.mxu2 %v2027_v26  ;;  %v2331_v26 = vor.u32 %v2943_v12, %v2328_v13  ;;  %v2715_v32 = vor.u32 %v3039_v21, %v2712_v24  ;;  %v2648_v11 = vld [vmem:[#allocation2 + $0x578] sm:$0xf0]  ;;  %v2395_v13 = vor.u32 %v2959_v4, %v2392_v7  ;;  %v3019_v24 = vld [vmem:[#allocation2 + $0x54c] sm:$0xf]  ;;  %v3056_v4 = vld [vmem:[#allocation4 + $0x70] sm:$0xff] }
  0x9e   :  { %1519 = vmatpush.bf16.msra.mxu3 %v2155_v30  ;;  %v2312_v30 = vld [vmem:[#allocation2 + $0x2d8] sm:$0xf0]  ;;  %v2651_v18 = vor.u32 %v3023_v10, %v2648_v11  ;;  %v3055_v10 = vld [vmem:[#allocation4 + $0x68] sm:$0xff] }
  0x9f   :  { %v2504_v21 = vld [vmem:[#allocation2 + $0x458] sm:$0xf0] }
  0xa0   :  { %1478 = vmatpush.bf16.msra.mxu0 %v2519_v37  ;;  %1492 = vmatpush.bf16.msra.mxu1 %v2647_v38  ;;  %v3035_v37 = vld [vmem:[#allocation2 + $0x5cc] sm:$0xf]  ;;  %v2696_v38 = vld [vmem:[#allocation2 + $0x5d8] sm:$0xf0] }
  0xa1   :  { %1506 = vmatpush.bf16.msra.mxu2 %v2011_v40  ;;  %v2315_v40 = vor.u32 %v2939_v29, %v2312_v30  ;;  %v2699_v46 = vor.u32 %v3035_v37, %v2696_v38  ;;  %v2919_v30 = vld [vmem:[#allocation2 + $0x22c] sm:$0xf]  ;;  %v2488_v37 = vld [vmem:[#allocation2 + $0x438] sm:$0xf0] }
  0xa2   :  { %1520 = vmatpush.bf16.msra.mxu3 %v2139_v44  ;;  %v2296_v44 = vld [vmem:[#allocation2 + $0x2b8] sm:$0xf0] }
  0xa4   :  { %1479 = vmatpush.bf16.msra.mxu0 %v2503_v50  ;;  %1493 = vmatpush.bf16.msra.mxu1 %v2631_v51  ;;  %v3031_v50 = vld [vmem:[#allocation2 + $0x5ac] sm:$0xf]  ;;  %v2680_v51 = vld [vmem:[#allocation2 + $0x5b8] sm:$0xf0] }
  0xa5   :  { %1507 = vmatpush.bf16.msra.mxu2 %v1995_v52  ;;  %v2299_v52 = vor.u32 %v2935_v43, %v2296_v44  ;;  %v2683_v59 = vor.u32 %v3031_v50, %v2680_v51  ;;  %v2491_v44 = vor.u32 %v2983_v36, %v2488_v37  ;;  %v2979_v50 = vld [vmem:[#allocation2 + $0x40c] sm:$0xf]  ;;  %v2472_v51 = vld [vmem:[#allocation2 + $0x418] sm:$0xf0]  ;;  %v3050_v36 = vld [vmem:[#allocation4 + $0x40] sm:$0xff] }
  0xa6   :  { %1521 = vmatpush.bf16.msra.mxu3 %v2123_v56  ;;  %v2280_v56 = vld [vmem:[#allocation2 + $0x298] sm:$0xf0]  ;;  %v2475_v58 = vor.u32 %v2979_v50, %v2472_v51 }
  0xa7   :  { %v2283_v0 = vor.u32 %v2931_v55, %v2280_v56  ;;  %v2347_v56 = vor.u32 %v2947_v47, %v2344_v49 }
  0xa8   :  { %1480 = vmatpush.bf16.msra.mxu0 %v2487_v63  ;;  %1494 = vmatpush.bf16.msra.mxu1 %v2615_v2  ;;  %v3027_v63 = vld [vmem:[#allocation2 + $0x58c] sm:$0xf] }
  0xa9   :  { %1508 = vmatpush.bf16.msra.mxu2 %v1979_v3  ;;  %v2927_v2 = vld [vmem:[#allocation2 + $0x26c] sm:$0xf]  ;;  %v2264_v3 = vld [vmem:[#allocation2 + $0x278] sm:$0xf0] }
  0xaa   :  { %1522 = vmatpush.bf16.msra.mxu3 %v2107_v8  ;;  %v2991_v8 = vld [vmem:[#allocation2 + $0x46c] sm:$0xf]  ;;  %v2267_v12 = vor.u32 %v2927_v2, %v2264_v3 }
  0xab   :  { %v2523_v14 = vor.u32 %v2991_v8, %v2520_v9 }
  0xac   :  { %1481 = vmatpush.bf16.msra.mxu0 %v2471_v15  ;;  %1495 = vmatpush.bf16.msra.mxu1 %v2599_v19  ;;  %v2923_v15 = vld [vmem:[#allocation2 + $0x24c] sm:$0xf]  ;;  %v2376_v19 = vld [vmem:[#allocation2 + $0x358] sm:$0xf0]  ;;  %v1273_v38 = vpop.f32.mrf.mxu1 }
  0xad   :  { %1509 = vmatpush.bf16.msra.mxu2 %v1963_v20  ;;  %v2987_v20 = vld [vmem:[#allocation2 + $0x44c] sm:$0xf] }
  0xae   :  { %1523 = vmatpush.bf16.msra.mxu3 %v2091_v25  ;;  %v2632_v25 = vld [vmem:[#allocation2 + $0x558] sm:$0xf0] }
  0xaf   :  { %1482 = vmatmul.bf16.vlgmr.msra.gmra.mxu0 %v3228_v35  ;;  %1496 = vmatmul.bf16.vlgmr.msra.gmra.mxu1 %v3230_v39  ;;  %v2635_v33 = vor.u32 %v3019_v24, %v2632_v25  ;;  %v3052_v24 = vld [vmem:[#allocation4 + $0x50] sm:$0xff] }
  0xb0   :  { %1530 = vmatpush.bf16.msrb.mxu0 %v2331_v26  ;;  %1544 = vmatpush.bf16.msrb.mxu1 %v2459_v27  ;;  %v2251_v26 = vor.u32 %v2923_v15, %v2248_v16  ;;  %v2379_v27 = vor.u32 %v2955_v17, %v2376_v19  ;;  %v1259_v29 = vpop.f32.mrf.mxu0  ;;  %v3054_v15 = vld [vmem:[#allocation4 + $0x60] sm:$0xff]  ;;  %v3044_v19 = vld [vmem:[#allocation4 + $0x10] sm:$0xff] }
  0xb1   :  { %1558 = vmatpush.bf16.msrb.mxu2 %v2587_v28  ;;  %1524 = vmatmul.bf16.vlgmr.msra.gmra.mxu3 %v3195_v6  ;;  %v2539_v6 = vor.u32 %v2995_v61, %v2536_v62  ;;  %v2507_v28 = vor.u32 %v2987_v20, %v2504_v21 }
  0xb2   :  { %1572 = vmatpush.bf16.msrb.mxu3 %v2715_v32  ;;  %1510 = vmatmul.bf16.vlgmr.msra.gmra.mxu2 %v3186_v57  ;;  %v2664_v57 = vld [vmem:[#allocation2 + $0x598] sm:$0xf0]  ;;  %v2951_v32 = vld [vmem:[#allocation2 + $0x32c] sm:$0xf] }
  0xb3   :  { %v2667_v5 = vor.u32 %v3027_v63, %v2664_v57  ;;  %v2363_v43 = vor.u32 %v2951_v32, %v2360_v34 }
  0xb4   :  { %1531 = vmatpush.bf16.msrb.mxu0 %v2315_v40  ;;  %1545 = vmatpush.bf16.msrb.mxu1 %v2443_v41  ;;  %v3015_v40 = vld [vmem:[#allocation2 + $0x52c] sm:$0xf]  ;;  %v2616_v41 = vld [vmem:[#allocation2 + $0x538] sm:$0xf0]  ;;  %v1275_v57 = vpop.f32.mrf.mxu1 }
  0xb5   :  { %1559 = vmatpush.bf16.msrb.mxu2 %v2571_v42  ;;  %v2235_v42 = vor.u32 %v2919_v30, %v2232_v31  ;;  %v2619_v48 = vor.u32 %v3015_v40, %v2616_v41  ;;  %v3042_v30 = vld [vmem:[#allocation4] sm:$0xff] }
  0xb6   :  { %1573 = vmatpush.bf16.msrb.mxu3 %v2699_v46  ;;  %v2216_v46 = vld [vmem:[#allocation2 + $0x218] sm:$0xf0] }
  0xb7   :  { %v2219_v55 = vor.u32 %v2915_v45, %v2216_v46  ;;  %v3065_v46 = vld [vmem:[#allocation4 + $0xb8] sm:$0xff] }
  0xb8   :  { %1532 = vmatpush.bf16.msrb.mxu0 %v2299_v52  ;;  %1546 = vmatpush.bf16.msrb.mxu1 %v2427_v53  ;;  %v3011_v52 = vld [vmem:[#allocation2 + $0x50c] sm:$0xf]  ;;  %v2600_v53 = vld [vmem:[#allocation2 + $0x518] sm:$0xf0]  ;;  %v1261_v63 = vpop.f32.mrf.mxu0 }
  0xb9   :  { %1560 = vmatpush.bf16.msrb.mxu2 %v2555_v54  ;;  %v3251_v54 = vld [vmem:[%s3269_s2] sm:$0xf] }
  0xba   :  { %1574 = vmatpush.bf16.msrb.mxu3 %v2683_v59  ;;  %v2603_v59 = vor.u32 %v3011_v52, %v2600_v53  ;;  %v252_v62 = vperm.slane %v3251_v54, 0 }
  0xbc   :  { %1533 = vmatpush.bf16.msrb.mxu0 %v2283_v0  ;;  %1547 = vmatpush.bf16.msrb.mxu1 %v2411_v1  ;;  %v3057_v0 = vld [vmem:[#allocation4 + $0x78] sm:$0xff]  ;;  %v3048_v1 = vld [vmem:[#allocation4 + $0x30] sm:$0xff]  ;;  %v1260_v2 = vadd.f32 %v1259_v29, %v252_v62  ;;  %v1262_v3 = vadd.f32 %v1261_v63, %v252_v62  ;;  %v3051_v29 = vld [vmem:[#allocation4 + $0x48] sm:$0xff] }
  0xbd   :  { %1561 = vmatpush.bf16.msrb.mxu2 %v2539_v6  ;;  %v1287_v61 = vpop.f32.mrf.mxu2  ;;  %v1301_v6 = vpop.f32.mrf.mxu3 }
  0xbe   :  { %1575 = vmatpush.bf16.msrb.mxu3 %v2667_v5  ;;  %v3047_v5 = vld [vmem:[#allocation4 + $0x28] sm:$0xff]  ;;  %v1274_v7 = vadd.f32 %v1273_v38, %v1260_v2  ;;  %v1276_v8 = vadd.f32 %v1275_v57, %v1262_v3  ;;  %v253_v38 = vperm.slane %v3251_v54, 1 }
  0xc0   :  { %1534 = vmatpush.bf16.msrb.mxu0 %v2267_v12  ;;  %1548 = vmatpush.bf16.msrb.mxu1 %v2395_v13  ;;  %v3046_v12 = vld [vmem:[#allocation4 + $0x20] sm:$0xff]  ;;  %v1288_v13 = vadd.f32 %v1287_v61, %v1274_v7  ;;  %v3060_v7 = vld [vmem:[#allocation4 + $0x90] sm:$0xff] }
  0xc1   :  { %1562 = vmatpush.bf16.msrb.mxu2 %v2523_v14 }
  0xc2   :  { %1576 = vmatpush.bf16.msrb.mxu3 %v2651_v18  ;;  %v1302_v16 = vadd.f32 %v1301_v6, %v1288_v13  ;;  %v3053_v18 = vld [vmem:[#allocation4 + $0x58] sm:$0xff] }
  0xc4   :  { %1535 = vmatpush.bf16.msrb.mxu0 %v2251_v26  ;;  %1549 = vmatpush.bf16.msrb.mxu1 %v2379_v27  ;;  %v3043_v26 = vld [vmem:[#allocation4 + $0x8] sm:$0xff] }
  0xc5   :  { %1563 = vmatpush.bf16.msrb.mxu2 %v2507_v28  ;;  %v1289_v9 = vpop.f32.mrf.mxu2 }
  0xc6   :  { %1577 = vmatpush.bf16.msrb.mxu3 %v2635_v33  ;;  %v1290_v14 = vadd.f32 %v1289_v9, %v1276_v8  ;;  %v3059_v8 = vld [vmem:[#allocation4 + $0x88] sm:$0xff] }
  0xc8   :  { %1536 = vmatpush.bf16.msrb.mxu0 %v2235_v42  ;;  %1550 = vmatpush.bf16.msrb.mxu1 %v2363_v43 }
  0xc9   :  { %1564 = vmatpush.bf16.msrb.mxu2 %v2491_v44 }
  0xca   :  { %1578 = vmatpush.bf16.msrb.mxu3 %v2619_v48  ;;  %v3064_v48 = vld [vmem:[#allocation4 + $0xb0] sm:$0xff] }
  0xcc   :  { %1537 = vmatpush.bf16.msrb.mxu0 %v2219_v55  ;;  %1551 = vmatpush.bf16.msrb.mxu1 %v2347_v56  ;;  %v1315_v11 = vpop.f32.mrf.mxu0  ;;  %v3063_v56 = vld [vmem:[#allocation4 + $0xa8] sm:$0xff] }
  0xcd   :  { %1565 = vmatpush.bf16.msrb.mxu2 %v2475_v58  ;;  %v1316_v20 = vadd.f32 %v1315_v11, %v1302_v16  ;;  %v3058_v11 = vld [vmem:[#allocation4 + $0x80] sm:$0xff] }
  0xce   :  { %1579 = vmatpush.bf16.msrb.mxu3 %v2603_v59 }
  0xcf   :  { %1538 = vmatmul.bf16.vlgmr.msrb.gmra.mxu0 %v3210_v22  ;;  %1552 = vmatmul.bf16.vlgmr.msrb.gmra.mxu1 %v3212_v23  ;;  %v1329_v22 = vpop.f32.mrf.mxu1  ;;  %v1303_v23 = vpop.f32.mrf.mxu3 }
  0xd0   :  { %1858 = vmatpush.bf16.msra.mxu0 %v3049_v60  ;;  %1872 = vmatpush.bf16.msra.mxu1 %v3057_v0  ;;  %v1330_v27 = vadd.f32 %v1329_v22, %v1316_v20  ;;  %v3062_v60 = vld [vmem:[#allocation4 + $0xa0] sm:$0xff]  ;;  %v3073_v22 = vld [vmem:[#allocation4 + $0xf8] sm:$0xff]  ;;  %v3071_v20 = vld [vmem:[#allocation4 + $0xe8] sm:$0xff] }
  0xd1   :  { %1566 = vmatmul.bf16.vlgmr.msrb.gmra.mxu2 %v3228_v35  ;;  %1580 = vmatmul.bf16.vlgmr.msrb.gmra.mxu3 %v3230_v39  ;;  %v3045_v35 = vld [vmem:[#allocation4 + $0x18] sm:$0xff]  ;;  %v1304_v39 = vadd.f32 %v1303_v23, %v1290_v14 }
  0xd2   :  { %v1586_v32 = vmax.f32 %v1330_v27, 0.0  ;;  %1886 = vmatpush.bf16.msra.mxu2 %v3065_v46  ;;  %1900 = vmatpush.bf16.msra.mxu3 %v3073_v22  ;;  %v3085_v22 = vld [vmem:[%s3271_s4] ss:$0 sm:$0xff] }
  0xd4   :  { %1859 = vmatpush.bf16.msra.mxu0 %v3048_v1  ;;  %1873 = vmatpush.bf16.msra.mxu1 %v3056_v4  ;;  %v1317_v17 = vpop.f32.mrf.mxu0 }
  0xd5   :  { %v1318_v21 = vadd.f32 %v1317_v17, %v1304_v39  ;;  %v1343_v31 = vpop.f32.mrf.mxu2 }
  0xd6   :  { %v1344_v40 = vadd.f32 %v1343_v31, %v253_v38  ;;  %1887 = vmatpush.bf16.msra.mxu2 %v3064_v48  ;;  %v255_v48 = vperm.slane %v3251_v54, 3 }
  0xd7   :  { %v1331_v25 = vpop.f32.mrf.mxu1  ;;  %v1357_v34 = vpop.f32.mrf.mxu3 }
  0xd8   :  { %1860 = vmatpush.bf16.msra.mxu0 %v3047_v5  ;;  %1874 = vmatpush.bf16.msra.mxu1 %v3055_v10  ;;  %v1332_v28 = vadd.f32 %v1331_v25, %v1318_v21  ;;  %v1358_v43 = vadd.f32 %v1357_v34, %v1344_v40  ;;  %v3061_v5 = vld [vmem:[#allocation4 + $0x98] sm:$0xff] }
  0xda   :  { %v1590_v33 = vmax.f32 %v1332_v28, 0.0  ;;  %1888 = vmatpush.bf16.msra.mxu2 %v3063_v56 }
  0xdc   :  { %1861 = vmatpush.bf16.msra.mxu0 %v3046_v12  ;;  %1875 = vmatpush.bf16.msra.mxu1 %v3054_v15  ;;  %v1594_v37 = vpack.c.bf16 %v1590_v33, %v1586_v32  ;;  %v254_v12 = vperm.slane %v3251_v54, 2  ;;  %v3072_v15 = vld [vmem:[#allocation4 + $0xf0] sm:$0xff]  ;;  %v3069_v32 = vld [vmem:[#allocation4 + $0xd8] sm:$0xff] }
  0xdd   :  { %v1345_v41 = vpop.f32.mrf.mxu2  ;;  %1901 = vmatpush.bf16.msra.mxu3 %v3072_v15 }
  0xde   :  { %v1346_v47 = vadd.f32 %v1345_v41, %v253_v38  ;;  %1889 = vmatpush.bf16.msra.mxu2 %v3062_v60  ;;  %v3068_v38 = vld [vmem:[#allocation4 + $0xd0] sm:$0xff] }
  0xdf   :  { %v1359_v42 = vpop.f32.mrf.mxu3 }
  0xe0   :  { %1862 = vmatpush.bf16.msra.mxu0 %v3045_v35  ;;  %1876 = vmatpush.bf16.msra.mxu1 %v3053_v18  ;;  %v1360_v50 = vadd.f32 %v1359_v42, %v1346_v47 }
  0xe1   :  { %1902 = vmatpush.bf16.msra.mxu3 %v3071_v20 }
  0xe2   :  { %1890 = vmatpush.bf16.msra.mxu2 %v3061_v5 }
  0xe4   :  { %1863 = vmatpush.bf16.msra.mxu0 %v3044_v19  ;;  %1877 = vmatpush.bf16.msra.mxu1 %v3052_v24 }
  0xe6   :  { %1891 = vmatpush.bf16.msra.mxu2 %v3060_v7 }
  0xe8   :  { %1864 = vmatpush.bf16.msra.mxu0 %v3043_v26  ;;  %1878 = vmatpush.bf16.msra.mxu1 %v3051_v29  ;;  %v3070_v26 = vld [vmem:[#allocation4 + $0xe0] sm:$0xff] }
  0xe9   :  { %1903 = vmatpush.bf16.msra.mxu3 %v3070_v26 }
  0xea   :  { %1892 = vmatpush.bf16.msra.mxu2 %v3059_v8 }
  0xec   :  { %1865 = vmatpush.bf16.msra.mxu0 %v3042_v30  ;;  %1879 = vmatpush.bf16.msra.mxu1 %v3050_v36  ;;  %v1371_v44 = vpop.f32.mrf.mxu0  ;;  %v1385_v45 = vpop.f32.mrf.mxu1 }
  0xed   :  { %v1372_v49 = vadd.f32 %v1371_v44, %v1358_v43  ;;  %1904 = vmatpush.bf16.msra.mxu3 %v3069_v32  ;;  %v3067_v43 = vld [vmem:[#allocation4 + $0xc8] sm:$0xff] }
  0xee   :  { %1893 = vmatpush.bf16.msra.mxu2 %v3058_v11 }
  0xef   :  { %1866 = vmatmul.bf16.vlgmr.msra.gmra.mxu0 %v1594_v37  ;;  %v1386_v52 = vadd.f32 %v1385_v45, %v1372_v49  ;;  %v3066_v45 = vld [vmem:[#allocation4 + $0xc0] sm:$0xff] }
  0xf1   :  { %1905 = vmatpush.bf16.msra.mxu3 %v3068_v38 }
  0xf4   :  { %v1373_v53 = vpop.f32.mrf.mxu0  ;;  %v1413_v55 = vpop.f32.mrf.mxu3 }
  0xf5   :  { %v1399_v51 = vpop.f32.mrf.mxu2  ;;  %v1374_v58 = vadd.f32 %v1373_v53, %v1360_v50  ;;  %v1387_v59 = vpop.f32.mrf.mxu1  ;;  %1906 = vmatpush.bf16.msra.mxu3 %v3067_v43 }
  0xf6   :  { %v1400_v61 = vadd.f32 %v1399_v51, %v1386_v52 }
  0xf7   :  { %v1388_v62 = vadd.f32 %v1387_v59, %v1374_v58 }
  0xf8   :  { %v1414_v57 = vadd.f32 %v1413_v55, %v1400_v61 }
  0xf9   :  { %1907 = vmatpush.bf16.msra.mxu3 %v3066_v45 }
  0xfa   :  { %v1587_v2 = vmax.f32 %v1414_v57, 0.0 }
  0xfc   :  { %v1415_v1 = vpop.f32.mrf.mxu3 }
  0xfd   :  { %v1401_v63 = vpop.f32.mrf.mxu2 }
  0xfe   :  { %v1402_v0 = vadd.f32 %v1401_v63, %v1388_v62 }
 0x100   :  { %v1416_v6 = vadd.f32 %v1415_v1, %v1402_v0 }
 0x102   :  { %v1591_v3 = vmax.f32 %v1416_v6, 0.0 }
 0x104   :  { %v1595_v4 = vpack.c.bf16 %v1591_v3, %v1587_v2 }
 0x106   :  { %1880 = vmatmul.bf16.vlgmr.msra.gmra.mxu1 %v1595_v4 }
 0x10c   :  { %v1427_v9 = vpop.f32.mrf.mxu0  ;;  %v1441_v10 = vpop.f32.mrf.mxu1 }
 0x10d   :  { %v1428_v13 = vadd.f32 %v1427_v9, %v254_v12 }
 0x10f   :  { %v1442_v35 = vadd.f32 %v1441_v10, %v1428_v13 }
 0x114   :  { %v1429_v23 = vpop.f32.mrf.mxu0  ;;  %v1443_v16 = vpop.f32.mrf.mxu1 }
 0x115   :  { %v1455_v14 = vpop.f32.mrf.mxu2  ;;  %v1469_v39 = vpop.f32.mrf.mxu3  ;;  %v1430_v17 = vadd.f32 %v1429_v23, %v254_v12 }
 0x116   :  { %v1456_v18 = vadd.f32 %v1455_v14, %v1442_v35 }
 0x117   :  { %v1444_v19 = vadd.f32 %v1443_v16, %v1430_v17 }
 0x118   :  { %v1470_v24 = vadd.f32 %v1469_v39, %v1456_v18 }
 0x11d   :  { %v1457_v21 = vpop.f32.mrf.mxu2  ;;  %v1471_v29 = vpop.f32.mrf.mxu3 }
 0x11e   :  { %v1458_v28 = vadd.f32 %v1457_v21, %v1444_v19 }
 0x120   :  { %v1472_v31 = vadd.f32 %v1471_v29, %v1458_v28 }
 0x12c   :  { %v1483_v25 = vpop.f32.mrf.mxu0  ;;  %v1497_v27 = vpop.f32.mrf.mxu1 }
 0x12d   :  { %v1484_v30 = vadd.f32 %v1483_v25, %v1470_v24 }
 0x12f   :  { %v1498_v33 = vadd.f32 %v1497_v27, %v1484_v30 }
 0x131   :  { %v1588_v40 = vmax.f32 %v1498_v33, 0.0 }
 0x134   :  { %v1485_v34 = vpop.f32.mrf.mxu0  ;;  %v1499_v37 = vpop.f32.mrf.mxu1 }
 0x135   :  { %v1486_v36 = vadd.f32 %v1485_v34, %v1472_v31  ;;  %v1511_v46 = vpop.f32.mrf.mxu2  ;;  %v1525_v47 = vpop.f32.mrf.mxu3 }
 0x136   :  { %v1512_v50 = vadd.f32 %v1511_v46, %v255_v48 }
 0x137   :  { %v1500_v41 = vadd.f32 %v1499_v37, %v1486_v36 }
 0x138   :  { %v1526_v55 = vadd.f32 %v1525_v47, %v1512_v50 }
 0x139   :  { %v1592_v42 = vmax.f32 %v1500_v41, 0.0 }
 0x13b   :  { %v1596_v44 = vpack.c.bf16 %v1592_v42, %v1588_v40 }
 0x13d   :  { %1894 = vmatmul.bf16.vlgmr.msra.gmra.mxu2 %v1596_v44  ;;  %v1513_v49 = vpop.f32.mrf.mxu2  ;;  %v1527_v51 = vpop.f32.mrf.mxu3 }
 0x13e   :  { %v1514_v56 = vadd.f32 %v1513_v49, %v255_v48 }
 0x140   :  { %v1528_v60 = vadd.f32 %v1527_v51, %v1514_v56 }
 0x14c   :  { %v1539_v52 = vpop.f32.mrf.mxu0  ;;  %v1553_v53 = vpop.f32.mrf.mxu1 }
 0x14d   :  { %v1540_v58 = vadd.f32 %v1539_v52, %v1526_v55 }
 0x14f   :  { %v1554_v63 = vadd.f32 %v1553_v53, %v1540_v58 }
 0x154   :  { %v1567_v59 = vpop.f32.mrf.mxu2  ;;  %v1581_v61 = vpop.f32.mrf.mxu3 }
 0x155   :  { %v1541_v62 = vpop.f32.mrf.mxu0  ;;  %v1568_v0 = vadd.f32 %v1567_v59, %v1554_v63  ;;  %v1555_v1 = vpop.f32.mrf.mxu1 }
 0x156   :  { %v1542_v57 = vadd.f32 %v1541_v62, %v1528_v60 }
 0x157   :  { %v1582_v3 = vadd.f32 %v1581_v61, %v1568_v0 }
 0x158   :  { %v1556_v6 = vadd.f32 %v1555_v1, %v1542_v57 }
 0x159   :  { %v1589_v7 = vmax.f32 %v1582_v3, 0.0 }
 0x15c   :  { %v1569_v2 = vpop.f32.mrf.mxu2  ;;  %v1583_v4 = vpop.f32.mrf.mxu3 }
 0x15d   :  { %v1570_v54 = vadd.f32 %v1569_v2, %v1556_v6 }
 0x15f   :  { %v1584_v5 = vadd.f32 %v1583_v4, %v1570_v54 }
 0x161   :  { %v1593_v8 = vmax.f32 %v1584_v5, 0.0 }
 0x163   :  { %v1597_v9 = vpack.c.bf16 %v1593_v8, %v1589_v7 }
 0x165   :  { %1908 = vmatmul.bf16.vlgmr.msra.gmra.mxu3 %v1597_v9 }
 0x16c   :  { %v1867_v10 = vpop.f32.mrf.mxu0 }
 0x16d   :  { %v1868_v23 = vadd.f32 %v3085_v22, %v1867_v10 }
 0x174   :  { %v1869_v13 = vpop.f32.mrf.mxu0 }
 0x175   :  { %v1870_v35 = vadd.f32 %v3085_v22, %v1869_v13 }
 0x183   :  { %v1881_v11 = vpop.f32.mrf.mxu1 }
 0x184   :  { %v1882_v39 = vadd.f32 %v1881_v11, %v1868_v23 }
 0x18b   :  { %v1883_v15 = vpop.f32.mrf.mxu1 }
 0x18c   :  { %v1884_v17 = vadd.f32 %v1883_v15, %v1870_v35 }
 0x1c0   :  { %v1895_v12 = vpop.f32.mrf.mxu2 }
 0x1c1   :  { %v1896_v18 = vadd.f32 %v1895_v12, %v1882_v39 }
 0x1c8   :  { %v1897_v16 = vpop.f32.mrf.mxu2 }
 0x1c9   :  { %v1898_v19 = vadd.f32 %v1897_v16, %v1884_v17 }
 0x1e8   :  { %v1909_v14 = vpop.f32.mrf.mxu3 }
 0x1e9   :  { %v1910_v21 = vadd.f32 %v1909_v14, %v1896_v18 }
 0x1f0   :  { %v1911_v20 = vpop.f32.mrf.mxu3 }
 0x1f1   :  { %v1912_v24 = vadd.f32 %v1911_v20, %v1898_v19 }
 0x1f3   :  { %v3077_v25 = vpack.c.bf16 %v1912_v24, %v1910_v21 }
 0x1f5   :  { %3078 = vst [vmem:[%s3272_s5] sm:$0xff] %v3077_v25  }
 0x1f6   :  { %1922 = vsyncpa [#allocation3], 1 }
 0x1f7   :  { %1923 = vsyncpa [#allocation5], 1 }

</bundles_post_ra>
